<compile_context>
chip_gen: v5e
topology: v5e:2x2
jax: 0.10.0
libtpu: 0.0.40
codegen_flags: <defaults>
</compile_context>

<pallas_src>
import functools

import numpy as np
import jax
import jax.numpy as jnp
from jax.experimental import pallas as pl
from jax.experimental.pallas import tpu as pltpu


# ----------------------------------------------------------------------------
# position_index construction (mirrors EarthAttention3D._construct_index)
# ----------------------------------------------------------------------------
def construct_position_index(window_shape):
    wZ, wH, wW = window_shape
    coords_zi = np.arange(wZ)
    coords_zj = -np.arange(wZ) * wZ
    coords_hi = np.arange(wH)
    coords_hj = -np.arange(wH) * wH
    coords_w = np.arange(wW)
    coords_1 = np.stack(
        np.meshgrid(coords_zi, coords_hi, coords_w, indexing="ij"), axis=0)
    coords_2 = np.stack(
        np.meshgrid(coords_zj, coords_hj, coords_w, indexing="ij"), axis=0)
    coords_1_flat = coords_1.reshape(3, -1)
    coords_2_flat = coords_2.reshape(3, -1)
    coords = coords_1_flat[:, :, None] - coords_2_flat[:, None, :]
    coords = coords.transpose(1, 2, 0).copy()
    coords[:, :, 2] += wW - 1
    coords[:, :, 1] *= 2 * wW - 1
    coords[:, :, 0] *= (2 * wW - 1) * wH ** 2
    return coords.sum(-1).reshape(-1)  # (L*L,)


# ----------------------------------------------------------------------------
# Pallas kernel: one grid step == BW windows that share the same window type
# ----------------------------------------------------------------------------
def _earth_attention_kernel(x_ref, wqkv_ref, bqkv_ref, wproj_ref, bproj_ref,
                            bias_ref, *rest, heads, has_mask):
    # x_ref:    (BW, 1, L, C)      f32/bf16  tokens of BW windows (same type)
    # wqkv_ref: (C, 3C)            bf16      QKV weight (scale folded into Q)
    # bqkv_ref: (1, 3C)            f32       QKV bias   (scale folded into Q)
    # wproj_ref:(C, C)             bf16      output projection weight
    # bproj_ref:(1, C)             f32       output projection bias
    # bias_ref: (1, heads, L, L)   f32       earth-specific bias (this type)
    # mask_ref: (BW, 1, L, L)      f32       optional shifted-window mask
    # o_ref:    (BW, 1, L, C)      x.dtype   output
    if has_mask:
        mask_ref, o_ref = rest
    else:
        (o_ref,) = rest
        mask_ref = None

    BW, _, L, C = x_ref.shape
    hd = C // heads
    M = BW * L
    f32 = jnp.float32
    bf16 = jnp.bfloat16

    # ---- fused QKV projection: one (M, C) @ (C, 3C) matmul for BW windows ---
    x = x_ref[...].reshape(M, C)
    qkv = jnp.dot(x.astype(bf16), wqkv_ref[...], preferred_element_type=f32)
    qkv = (qkv + bqkv_ref[...]).astype(bf16)       # cast BEFORE the relayouts

    # ---- rearrange channel layout [which, head, hd] into (head*window, L, hd)
    #      batches (2D / minor transposes + last-dim-safe reshapes, in bf16).
    qkv_t = qkv.T                                   # (3C, M)   bf16
    qkv_t = qkv_t.reshape(3 * heads, hd, M)         # split channel groups
    qkv_t = jnp.swapaxes(qkv_t, 1, 2)               # (3*heads, M, hd)
    q = qkv_t[:heads].reshape(heads * BW, L, hd)
    k = qkv_t[heads:2 * heads].reshape(heads * BW, L, hd)
    v = qkv_t[2 * heads:].reshape(heads * BW, L, hd)

    # ---- attention scores (scale already folded into W_q / b_q) -------------
    s = jnp.einsum("bqd,bkd->bqk", q, k,
                   preferred_element_type=f32)      # (heads*BW, L, L) f32
    s = s.reshape(heads, BW, L, L)
    s = s + bias_ref[0][:, None, :, :]              # + earth bias (f32)
    if mask_ref is not None:
        s = s + mask_ref[...].reshape(1, BW, L, L)  # + window mask (f32)

    # ---- numerically stable softmax numerator; normalization is deferred ----
    s = s - jnp.max(s, axis=-1, keepdims=True)
    e = jnp.exp(s)                                  # f32, values <= 1
    inv_den = pl.reciprocal(jnp.sum(e, axis=-1, keepdims=True), approx=True)
    e_b = e.astype(bf16).reshape(heads * BW, L, L)

    # ---- (unnormalized) attention @ V, then scale by 1/denominator ----------
    pv = jnp.einsum("bqk,bkd->bqd", e_b, v,
                    preferred_element_type=f32)     # (heads*BW, L, hd) f32
    pv = pv * inv_den.reshape(heads * BW, L, 1)     # deferred normalization

    # ---- back to (M, C) with channel layout [head, hd] (relayout in bf16) ----
    ctx = pv.astype(bf16).reshape(heads, M, hd)
    ctx = jnp.swapaxes(ctx, 1, 2)                   # (heads, hd, M)
    ctx = ctx.reshape(C, M).T                       # (M, C) bf16

    # ---- output projection ----------------------------------------------------
    y = jnp.dot(ctx, wproj_ref[...], preferred_element_type=f32) + bproj_ref[...]
    o_ref[...] = y.reshape(BW, 1, L, C).astype(o_ref.dtype)
    # TODO(synk): attn_drop / proj_drop with rate > 0 (training mode) not implemented.


# ----------------------------------------------------------------------------
# Generation-aware VMEM configuration
# ----------------------------------------------------------------------------
def _vmem_config():
    """Returns (vmem_limit_bytes, block-size budget) for the current TPU."""
    try:
        cap = int(pltpu.get_tpu_info().vmem_capacity_bytes)
    except Exception:                       # API unavailable -> conservative
        cap = 64 * 1024 * 1024
    # 128 MiB parts (v5e/v6e) -> 96 MiB limit; 64 MiB-per-TC v7x -> 48 MiB.
    vmem_limit = min(cap * 3 // 4, 96 * 1024 * 1024)
    # Conservative budget for choosing BW (headroom for Mosaic scratch/spills).
    return vmem_limit, vmem_limit // 2


# ----------------------------------------------------------------------------
# Block-size heuristic: largest divisor of `n` windows that fits the budget
# ----------------------------------------------------------------------------
def _pick_block_windows(n, L, C, heads, *, x_itemsize, has_mask, vmem_budget,
                        target_m=512):
    # Resident (BW-independent) blocks: weights/bias, double-buffered by the
    # default pipeline even though their block index never changes.
    resident = 2 * (2 * C * 3 * C          # w_qkv  (bf16)
                    + 4 * 3 * C            # b_qkv  (f32)
                    + 2 * C * C            # w_proj (bf16)
                    + 4 * C                # b_proj (f32)
                    + 4 * heads * L * L)   # earth bias (f32)
    # Per-window cost: pipeline buffers + in-kernel temporaries (including the
    # materialized relayout copies).
    per_window = (
        2 * 2 * L * C * x_itemsize         # x + out blocks, double-buffered
        + L * 3 * C * (4 + 2 + 2)          # qkv f32, qkv bf16, q/k/v relayout
        + heads * L * L * (4 + 4 + 2)      # scores f32, exp f32, exp bf16
        + L * C * (4 + 2 + 4))             # pv f32, ctx bf16, y f32
    if has_mask:
        per_window += 2 * L * L * 4        # mask block (f32), double-buffered
    cap = max(1, max(0, vmem_budget - resident) // max(per_window, 1))
    # Aim for an MXU-friendly M = BW*L (>= target_m) but never exceed the cap.
    cap = min(cap, max(8, pl.cdiv(target_m, L)))
    best = 1
    for d in range(1, n + 1):
        if n % d == 0 and d <= cap:
            best = d
    return best


# ----------------------------------------------------------------------------
# Wrapper: parameter plumbing + pallas_call
# ----------------------------------------------------------------------------
def earth_attention_3d(x, params, *, input_shape, window_shape, heads, mask=None):
    B_, L, C = x.shape
    nZ, nH, nW = (s // w for s, w in zip(input_shape, window_shape))
    T = nZ * nH                      # window_types
    num_windows = T * nW
    assert B_ % T == 0, "batch*windows must be a multiple of window_types"
    F = B_ // T                      # windows of each type
    hd = C // heads
    scale = float(hd) ** -0.5

    # Fold the attention scale into the Q columns of the QKV projection.
    w_qkv = params["w_qkv"]
    b_qkv = params["b_qkv"]
    w_qkv = jnp.concatenate([w_qkv[:, :C] * scale, w_qkv[:, C:]], axis=1)
    b_qkv = jnp.concatenate([b_qkv[:C] * scale, b_qkv[C:]])

    # Earth-specific bias gather -> (T, heads, L, L), kept f32 (resident/small).
    pos_idx = jnp.asarray(construct_position_index(window_shape))
    bias = params["earth_specific_bias"][pos_idx]                   # (L*L, T, heads)
    bias = bias.reshape(L, L, T, heads).transpose(2, 3, 0, 1)       # (T, heads, L, L)
    bias = bias.astype(jnp.float32)

    w_qkv_bf = w_qkv.astype(jnp.bfloat16)
    w_proj_bf = params["w_proj"].astype(jnp.bfloat16)
    b_qkv2 = b_qkv.reshape(1, 3 * C).astype(jnp.float32)
    b_proj2 = params["b_proj"].reshape(1, C).astype(jnp.float32)

    # b = f*T + t  ->  window type t = b % T (matches the reference tiling).
    x4 = x.reshape(F, T, L, C)

    vmem_limit, bw_budget = _vmem_config()
    x_itemsize = int(np.dtype(x.dtype).itemsize)
    has_mask = mask is not None

    if has_mask:
        assert mask.shape == (num_windows, L, L)
        assert F % nW == 0
        BW = _pick_block_windows(nW, L, C, heads, x_itemsize=x_itemsize,
                                 has_mask=True, vmem_budget=bw_budget)
        # mask window index for window b is (f % nW)*T + t  ->  (nW, T, L, L)
        mask4 = mask.reshape(nW, T, L, L).astype(jnp.float32)
        n_mask_blocks = nW // BW
        # grid = (type, mask-block, repeat): mask index depends only on (t, m)
        # and bias only on t, so both stay resident across the inner axis.
        grid = (T, n_mask_blocks, F // nW)
        x_idx = lambda t, m, g: (g * n_mask_blocks + m, t, 0, 0)
        w_idx = lambda t, m, g: (0, 0)
        bias_idx = lambda t, m, g: (t, 0, 0, 0)
        mask_idx = lambda t, m, g: (m, t, 0, 0)
    else:
        BW = _pick_block_windows(F, L, C, heads, x_itemsize=x_itemsize,
                                 has_mask=False, vmem_budget=bw_budget)
        grid = (T, F // BW)
        x_idx = lambda t, f: (f, t, 0, 0)
        w_idx = lambda t, f: (0, 0)
        bias_idx = lambda t, f: (t, 0, 0, 0)

    in_specs = [
        pl.BlockSpec((BW, 1, L, C), x_idx),
        pl.BlockSpec((C, 3 * C), w_idx),
        pl.BlockSpec((1, 3 * C), w_idx),
        pl.BlockSpec((C, C), w_idx),
        pl.BlockSpec((1, C), w_idx),
        pl.BlockSpec((1, heads, L, L), bias_idx),   # resident per window type
    ]
    args = [x4, w_qkv_bf, b_qkv2, w_proj_bf, b_proj2, bias]
    if has_mask:
        in_specs.append(pl.BlockSpec((BW, 1, L, L), mask_idx))
        args.append(mask4)

    out_spec = pl.BlockSpec((BW, 1, L, C), x_idx)

    # No accumulator across any grid axis -> all axes are independent.
    compiler_params = pltpu.CompilerParams(
        dimension_semantics=("parallel",) * len(grid),
        vmem_limit_bytes=vmem_limit,
    )

    kernel = functools.partial(_earth_attention_kernel,
                               heads=heads, has_mask=has_mask)

    out4 = pl.pallas_call(
        kernel,
        out_shape=jax.ShapeDtypeStruct((F, T, L, C), x.dtype),
        grid=grid,
        in_specs=in_specs,
        out_specs=out_spec,
        compiler_params=compiler_params,
    )(*args)

    return out4.reshape(B_, L, C)


# ----------------------------------------------------------------------------
# Pure-JAX reference (mirrors the PyTorch forward) for correctness checking
# ----------------------------------------------------------------------------
def earth_attention_3d_ref(x, params, *, input_shape, window_shape, heads, mask=None):
    B_, L, C = x.shape
    hd = C // heads
    scale = float(hd) ** -0.5
    nZ, nH, nW = (s // w for s, w in zip(input_shape, window_shape))
    window_types = nZ * nH

    qkv = x @ params["w_qkv"] + params["b_qkv"]
    qkv = qkv.reshape(B_, L, 3, heads, hd).transpose(2, 0, 3, 1, 4)
    q, k, v = qkv[0] * scale, qkv[1], qkv[2]
    attn = jnp.einsum("bhqd,bhkd->bhqk", q, k)

    pos_idx = jnp.asarray(construct_position_index(window_shape))
    bias = params["earth_specific_bias"][pos_idx]
    bias = bias.reshape(L, L, window_types, heads).transpose(2, 3, 0, 1)
    bias = jnp.tile(bias, (B_ // window_types, 1, 1, 1))
    attn = attn + bias
    if mask is not None:
        mrep = jnp.tile(mask, (B_ // (window_types * nW), 1, 1))
        attn = attn + mrep[:, None]
    attn = jax.nn.softmax(attn, axis=-1)
    out = jnp.einsum("bhqk,bhkd->bhqd", attn, v).transpose(0, 2, 1, 3).reshape(B_, L, C)
    return out @ params["w_proj"] + params["b_proj"]


# ----------------------------------------------------------------------------
# Main
# ----------------------------------------------------------------------------
if __name__ == "__main__":
    # Small synthetic configuration (tune/benchmark only with production shapes,
    # e.g. L=144, C>=192 — the binding unit flips between toy and real configs).
    input_shape = (2, 4, 8)     # (Z, H, W) after patch embedding
    window_shape = (2, 2, 4)    # (wZ, wH, wW)
    dim = 32
    heads = 4
    B = 2

    wZ, wH, wW = window_shape
    nZ, nH, nW = (s // w for s, w in zip(input_shape, window_shape))
    window_types = nZ * nH
    num_windows = nZ * nH * nW
    L = wZ * wH * wW
    B_ = B * num_windows

    key = jax.random.PRNGKey(0)
    k1, k2, k3, k4, k5, k6, k7 = jax.random.split(key, 7)

    params = {
        "w_qkv": jax.random.normal(k1, (dim, 3 * dim), jnp.float32) * 0.05,
        "b_qkv": jax.random.normal(k2, (3 * dim,), jnp.float32) * 0.05,
        "w_proj": jax.random.normal(k3, (dim, dim), jnp.float32) * 0.05,
        "b_proj": jax.random.normal(k4, (dim,), jnp.float32) * 0.05,
        # trunc_normal_(std=0.02)
        "earth_specific_bias": jax.random.truncated_normal(
            k5, -2.0, 2.0,
            (wZ ** 2 * wH ** 2 * (2 * wW - 1), window_types, heads),
            jnp.float32) * 0.02,
    }

    x = jax.random.normal(k6, (B_, L, dim), jnp.float32)

    # bf16 matmul operands inside the kernel -> compare with loosened tolerance.
    RTOL, ATOL = 2e-2, 2e-2

    # --- mask = None path ---
    out = earth_attention_3d(
        x, params, input_shape=input_shape, window_shape=window_shape, heads=heads)
    out = jax.block_until_ready(out)
    ref = earth_attention_3d_ref(
        x, params, input_shape=input_shape, window_shape=window_shape, heads=heads)
    np.testing.assert_allclose(np.asarray(out), np.asarray(ref), rtol=RTOL, atol=ATOL)

    # --- shifted-window mask path ---
    mask_bits = jax.random.bernoulli(k7, 0.3, (num_windows, L, L))
    mask = jnp.where(mask_bits, -1e4, 0.0).astype(jnp.float32)
    out_m = earth_attention_3d(
        x, params, input_shape=input_shape, window_shape=window_shape,
        heads=heads, mask=mask)
    out_m = jax.block_until_ready(out_m)
    ref_m = earth_attention_3d_ref(
        x, params, input_shape=input_shape, window_shape=window_shape,
        heads=heads, mask=mask)
    np.testing.assert_allclose(np.asarray(out_m), np.asarray(ref_m), rtol=RTOL, atol=ATOL)

    print("KERNEL_OK")
</pallas_src>

<mosaic_0001>
module attributes {stable_mosaic.version = 11 : i64} {
  func.func @_earth_attention_kernel(%arg0: i32, %arg1: i32, %arg2: memref<4x1x16x32xf32, #tpu.memory_space<vmem>>, %arg3: memref<32x96xbf16, #tpu.memory_space<vmem>>, %arg4: memref<1x96xf32, #tpu.memory_space<vmem>>, %arg5: memref<32x32xbf16, #tpu.memory_space<vmem>>, %arg6: memref<1x32xf32, #tpu.memory_space<vmem>>, %arg7: memref<1x4x16x16xf32, #tpu.memory_space<vmem>>, %arg8: memref<4x1x16x32xf32, #tpu.memory_space<vmem>>) attributes {dimension_semantics = [#tpu.dimension_semantics<parallel>, #tpu.dimension_semantics<parallel>], iteration_bounds = array<i64: 2, 1>, scalar_prefetch = 0 : i64, scratch_operands = 0 : i64, tpu.core_type = #tpu.core_type<tc>, window_params = [{transform_indices = @transform_0, window_bounds = array<i64: 4, 1, 16, 32>}, {pipeline_mode = #tpu.pipeline_mode<synchronous>, transform_indices = @transform_1, window_bounds = array<i64: 32, 96>}, {pipeline_mode = #tpu.pipeline_mode<synchronous>, transform_indices = @transform_2, window_bounds = array<i64: 1, 96>}, {pipeline_mode = #tpu.pipeline_mode<synchronous>, transform_indices = @transform_3, window_bounds = array<i64: 32, 32>}, {pipeline_mode = #tpu.pipeline_mode<synchronous>, transform_indices = @transform_4, window_bounds = array<i64: 1, 32>}, {transform_indices = @transform_5, window_bounds = array<i64: 1, 4, 16, 16>}, {transform_indices = @transform_6, window_bounds = array<i64: 4, 1, 16, 32>}]} {
    %c0 = arith.constant 0 : index
    %c0_0 = arith.constant 0 : index
    %c0_1 = arith.constant 0 : index
    %c0_2 = arith.constant 0 : index
    %0 = vector.load %arg2[%c0, %c0_0, %c0_1, %c0_2] : memref<4x1x16x32xf32, #tpu.memory_space<vmem>>, vector<4x1x16x32xf32>
    %1 = vector.shape_cast %0 : vector<4x1x16x32xf32> to vector<64x32xf32>
    %2 = arith.truncf %1 : vector<64x32xf32> to vector<64x32xbf16>
    %c0_3 = arith.constant 0 : index
    %c0_4 = arith.constant 0 : index
    %3 = vector.load %arg3[%c0_3, %c0_4] : memref<32x96xbf16, #tpu.memory_space<vmem>>, vector<32x96xbf16>
    %cst = arith.constant dense<0.000000e+00> : vector<64x96xf32>
    %4 = tpu.matmul %2, %3, %cst {dimension_numbers = #tpu.dot_dimension_numbers<[1], [0], [0], [1], [0, 0, 1, 1], [], []>} : vector<64x32xbf16>, vector<32x96xbf16>, vector<64x96xf32> -> vector<64x96xf32>
    %c0_5 = arith.constant 0 : index
    %c0_6 = arith.constant 0 : index
    %5 = vector.load %arg4[%c0_5, %c0_6] : memref<1x96xf32, #tpu.memory_space<vmem>>, vector<1x96xf32>
    %6 = vector.broadcast %5 : vector<1x96xf32> to vector<64x96xf32>
    %7 = arith.addf %4, %6 : vector<64x96xf32>
    %8 = arith.truncf %7 : vector<64x96xf32> to vector<64x96xbf16>
    %9 = tpu.transpose %8, [1, 0] : vector<64x96xbf16> -> vector<96x64xbf16>
    %10 = vector.shape_cast %9 : vector<96x64xbf16> to vector<12x8x64xbf16>
    %11 = tpu.transpose %10, [0, 2, 1] : vector<12x8x64xbf16> -> vector<12x64x8xbf16>
    %12 = vector.extract_strided_slice %11 {offsets = [0, 0, 0], sizes = [4, 64, 8], strides = [1, 1, 1]} : vector<12x64x8xbf16> to vector<4x64x8xbf16>
    %13 = vector.shape_cast %12 : vector<4x64x8xbf16> to vector<16x16x8xbf16>
    %14 = vector.extract_strided_slice %11 {offsets = [4, 0, 0], sizes = [4, 64, 8], strides = [1, 1, 1]} : vector<12x64x8xbf16> to vector<4x64x8xbf16>
    %15 = vector.shape_cast %14 : vector<4x64x8xbf16> to vector<16x16x8xbf16>
    %16 = vector.extract_strided_slice %11 {offsets = [8, 0, 0], sizes = [4, 64, 8], strides = [1, 1, 1]} : vector<12x64x8xbf16> to vector<4x64x8xbf16>
    %17 = vector.shape_cast %16 : vector<4x64x8xbf16> to vector<16x16x8xbf16>
    "tpu.trace_start"() <{level = 10 : i32, message = "bqd,bkd->bqk"}> : () -> ()
    %cst_7 = arith.constant dense<0.000000e+00> : vector<16x16x16xf32>
    %18 = tpu.matmul %13, %15, %cst_7 {dimension_numbers = #tpu.dot_dimension_numbers<[2], [2], [1], [1], [0, 0, 0, 1, 1, 1], [0], [0]>} : vector<16x16x8xbf16>, vector<16x16x8xbf16>, vector<16x16x16xf32> -> vector<16x16x16xf32>
    "tpu.trace_stop"() : () -> ()
    %19 = vector.shape_cast %18 : vector<16x16x16xf32> to vector<4x4x16x16xf32>
    %c0_8 = arith.constant 0 : index
    %c0_9 = arith.constant 0 : index
    %c0_10 = arith.constant 0 : index
    %c0_11 = arith.constant 0 : index
    %20 = vector.load %arg7[%c0_8, %c0_9, %c0_10, %c0_11] : memref<1x4x16x16xf32, #tpu.memory_space<vmem>>, vector<1x4x16x16xf32>
    %21 = vector.shape_cast %20 : vector<1x4x16x16xf32> to vector<4x16x16xf32>
    %22 = vector.shape_cast %21 : vector<4x16x16xf32> to vector<4x1x16x16xf32>
    %23 = vector.broadcast %22 : vector<4x1x16x16xf32> to vector<4x4x16x16xf32>
    %24 = arith.addf %19, %23 : vector<4x4x16x16xf32>
    %cst_12 = arith.constant dense<0xFF800000> : vector<4x4x16xf32>
    %25 = vector.multi_reduction <maximumf>, %24, %cst_12 [3] : vector<4x4x16x16xf32> to vector<4x4x16xf32>
    %26 = vector.shape_cast %25 : vector<4x4x16xf32> to vector<4x4x16x1xf32>
    %27 = vector.broadcast %26 : vector<4x4x16x1xf32> to vector<4x4x16x16xf32>
    %28 = arith.subf %24, %27 : vector<4x4x16x16xf32>
    %29 = math.exp %28 : vector<4x4x16x16xf32>
    %cst_13 = arith.constant dense<0.000000e+00> : vector<4x4x16xf32>
    %30 = vector.multi_reduction <add>, %29, %cst_13 [3] : vector<4x4x16x16xf32> to vector<4x4x16xf32>
    %31 = vector.shape_cast %30 : vector<4x4x16xf32> to vector<4x4x16x1xf32>
    %32 = tpu.reciprocal %31 {approx = true} : vector<4x4x16x1xf32> -> vector<4x4x16x1xf32>
    %33 = arith.truncf %29 : vector<4x4x16x16xf32> to vector<4x4x16x16xbf16>
    %34 = vector.shape_cast %33 : vector<4x4x16x16xbf16> to vector<16x16x16xbf16>
    "tpu.trace_start"() <{level = 10 : i32, message = "bqk,bkd->bqd"}> : () -> ()
    %cst_14 = arith.constant dense<0.000000e+00> : vector<16x16x8xf32>
    %35 = tpu.matmul %34, %17, %cst_14 {dimension_numbers = #tpu.dot_dimension_numbers<[2], [1], [1], [2], [0, 0, 0, 1, 1, 2], [0], [0]>} : vector<16x16x16xbf16>, vector<16x16x8xbf16>, vector<16x16x8xf32> -> vector<16x16x8xf32>
    "tpu.trace_stop"() : () -> ()
    %36 = vector.shape_cast %32 : vector<4x4x16x1xf32> to vector<16x16x1xf32>
    %37 = vector.broadcast %36 : vector<16x16x1xf32> to vector<16x16x8xf32>
    %38 = arith.mulf %35, %37 : vector<16x16x8xf32>
    %39 = arith.truncf %38 : vector<16x16x8xf32> to vector<16x16x8xbf16>
    %40 = vector.shape_cast %39 : vector<16x16x8xbf16> to vector<4x64x8xbf16>
    %41 = tpu.transpose %40, [0, 2, 1] : vector<4x64x8xbf16> -> vector<4x8x64xbf16>
    %42 = vector.shape_cast %41 : vector<4x8x64xbf16> to vector<32x64xbf16>
    %43 = tpu.transpose %42, [1, 0] : vector<32x64xbf16> -> vector<64x32xbf16>
    %c0_15 = arith.constant 0 : index
    %c0_16 = arith.constant 0 : index
    %44 = vector.load %arg5[%c0_15, %c0_16] : memref<32x32xbf16, #tpu.memory_space<vmem>>, vector<32x32xbf16>
    %cst_17 = arith.constant dense<0.000000e+00> : vector<64x32xf32>
    %45 = tpu.matmul %43, %44, %cst_17 {dimension_numbers = #tpu.dot_dimension_numbers<[1], [0], [0], [1], [0, 0, 1, 1], [], []>} : vector<64x32xbf16>, vector<32x32xbf16>, vector<64x32xf32> -> vector<64x32xf32>
    %c0_18 = arith.constant 0 : index
    %c0_19 = arith.constant 0 : index
    %46 = vector.load %arg6[%c0_18, %c0_19] : memref<1x32xf32, #tpu.memory_space<vmem>>, vector<1x32xf32>
    %47 = vector.broadcast %46 : vector<1x32xf32> to vector<64x32xf32>
    %48 = arith.addf %45, %47 : vector<64x32xf32>
    %49 = vector.shape_cast %48 : vector<64x32xf32> to vector<4x1x16x32xf32>
    %c0_20 = arith.constant 0 : index
    %c0_21 = arith.constant 0 : index
    %c0_22 = arith.constant 0 : index
    %c0_23 = arith.constant 0 : index
    %50 = vector.load %arg8[%c0_20, %c0_21, %c0_22, %c0_23] : memref<4x1x16x32xf32, #tpu.memory_space<vmem>>, vector<4x1x16x32xf32>
    tpu.vector_store %arg8[%c0_20, %c0_21, %c0_22, %c0_23], %49 {strides = array<i32>} : memref<4x1x16x32xf32, #tpu.memory_space<vmem>>, vector<4x1x16x32xf32>,
    return
  }
  func.func @transform_0(%arg0: i32, %arg1: i32) -> (i32, i32, i32, i32) {
    %c0_i32 = arith.constant 0 : i32
    %c0_i32_0 = arith.constant 0 : i32
    %c0_i32_1 = arith.constant 0 : i32
    return %arg1, %arg0, %c0_i32, %c0_i32_0 : i32, i32, i32, i32
  }
  func.func @transform_1(%arg0: i32, %arg1: i32) -> (i32, i32) {
    %c0_i32 = arith.constant 0 : i32
    %c0_i32_0 = arith.constant 0 : i32
    %c0_i32_1 = arith.constant 0 : i32
    return %c0_i32, %c0_i32_0 : i32, i32
  }
  func.func @transform_2(%arg0: i32, %arg1: i32) -> (i32, i32) {
    %c0_i32 = arith.constant 0 : i32
    %c0_i32_0 = arith.constant 0 : i32
    %c0_i32_1 = arith.constant 0 : i32
    return %c0_i32, %c0_i32_0 : i32, i32
  }
  func.func @transform_3(%arg0: i32, %arg1: i32) -> (i32, i32) {
    %c0_i32 = arith.constant 0 : i32
    %c0_i32_0 = arith.constant 0 : i32
    %c0_i32_1 = arith.constant 0 : i32
    return %c0_i32, %c0_i32_0 : i32, i32
  }
  func.func @transform_4(%arg0: i32, %arg1: i32) -> (i32, i32) {
    %c0_i32 = arith.constant 0 : i32
    %c0_i32_0 = arith.constant 0 : i32
    %c0_i32_1 = arith.constant 0 : i32
    return %c0_i32, %c0_i32_0 : i32, i32
  }
  func.func @transform_5(%arg0: i32, %arg1: i32) -> (i32, i32, i32, i32) {
    %c0_i32 = arith.constant 0 : i32
    %c0_i32_0 = arith.constant 0 : i32
    %c0_i32_1 = arith.constant 0 : i32
    %c0_i32_2 = arith.constant 0 : i32
    return %arg0, %c0_i32, %c0_i32_0, %c0_i32_1 : i32, i32, i32, i32
  }
  func.func @transform_6(%arg0: i32, %arg1: i32) -> (i32, i32, i32, i32) {
    %c0_i32 = arith.constant 0 : i32
    %c0_i32_0 = arith.constant 0 : i32
    %c0_i32_1 = arith.constant 0 : i32
    return %arg1, %arg0, %c0_i32, %c0_i32_0 : i32, i32, i32, i32
  }
}

</mosaic_0001>

<bundles_post_ra>
// kernel: tpu_custom_call.1
= control target key start
LH: loop header
LB: loop body
LE: loop exit
PB: predicated region body
PF: predicated region fallthrough
CT: control target
= control target key end

     0   :  { %s3626_s0 = inlined_call_operand.hbm [shape: f32[4,2,16,32], index: 0, kind: input, shape index: {}]   ;;  %s3627_s1 = inlined_call_operand.hbm [shape: bf16[32,96], index: 1, kind: input, shape index: {}]   ;;  %s3628_s2 = inlined_call_operand.vmem [shape: f32[1,96], index: 2, kind: input, shape index: {}]   ;;  %s3629_s3 = inlined_call_operand.hbm [shape: bf16[32,32], index: 3, kind: input, shape index: {}]   ;;  %s3630_s4 = inlined_call_operand.vmem [shape: f32[1,32], index: 4, kind: input, shape index: {}]   ;;  %s3631_s5 = inlined_call_operand.hbm [shape: f32[2,4,16,16], index: 5, kind: input, shape index: {}]   ;;  %s3632_s6 = inlined_call_operand.hbm [shape: f32[4,2,16,32], index: 6, kind: output, shape index: {}]  }
   0x1   :  { %3637 = sst [smem:[#allocation24_spill]] %s3626_s0 }
   0x2   :  { %3638 = sst [smem:[#allocation25_spill]] %s3627_s1 }
   0x3   :  { %3639 = sst [smem:[#allocation26_spill]] %s3629_s3 }
   0x4   :  { %11 = vsyncpa [#allocation3], 0 }
   0x5   :  { %13 = vsyncpa [#allocation3 + $0x1], 0 }
   0x6   :  { %14 = vsyncpa [#allocation6], 0 }
   0x7   :  { %15 = vsyncpa [#allocation9], 0 }
   0x8   :  { %17 = vsyncpa [#allocation9 + $0x1], 0 }
   0x9   :  { %18 = vsyncpa [#allocation4], 0 }
   0xa   :  { %20 = vsyncpa [#allocation4 + $0x1], 0  ;;  %s2887_s21 = smov 0   ;;  %s2889_s22 = smov 0  }
   0xb   :  { %s2891_s23 = smov 0   ;;  %s2893_s24 = smov 0  }
   0xc   :  { %s2895_s25 = smov 0   ;;  %s2897_s26 = smov 0  }
   0xd LB: > { %3640 = sst [smem:[#allocation20_spill]] %s2819_s23  ;;  %s2280_s27 = sadd.s32 4294967295, %s2831_s26   ;;  %s2831_s26 = sphi %s2897_s26, %s26_s26   ;;  %s2827_s25 = sphi %s2895_s25, %s3662_s25   ;;  %s2823_s24 = sphi %s2893_s24, %s3661_s24   ;;  %s2819_s23 = sphi %s2891_s23, %s3657_s23   ;;  %s2815_s22 = sphi %s2889_s22, %s3660_s22   ;;  %s2811_s21 = sphi %s2887_s21, %s3659_s21  }
   0xe   : > { %3641 = sst [smem:[#allocation21_spill]] %s2831_s26  ;;  %s2281_s28 = sadd.s32 4294967294, %s2831_s26  }
   0xf   : > { %s38_s29 = sadd.s32 1, %s2827_s25  ;;  %s47_s30 = sadd.s32 1, %s2819_s23 }
  0x10   : > { %p40_p0 = scmp.ge.s32.totalorder %s38_s29, 2  ;;  %p54_p1 = scmp.ne.s32.totalorder %s2819_s23, %s2815_s22 }
  0x11   : > { %p55_p2 = scmp.eq.s32.totalorder %s2831_s26, 0  ;;  %p60_p3 = scmp.ne.s32.totalorder %s2815_s22, %s2811_s21 }
  0x12   : > { %s3664_s29 = smov (%p40_p0, %s38_s29), 0  ;;  %p2932_p5 = scmp.eq.s32.totalorder %s2280_s27, 0 }
  0x13   : > { %3642 = sst [smem:[#allocation22_spill]] %s3664_s29  ;;  %p2928_p4 = por %p55_p2, %p54_p1 }
  0x14   : > { %s43_s9 = ssub.s32 %s2827_s25, %s3664_s29  ;;  %p196_p6 = scmp.eq.s32.totalorder %s2280_s27, 1 }
  0x15   : > { %p45_p7 = scmp.eq.s32.totalorder %s43_s9, 0  ;;  %p2940_p8 = por %p2932_p5, %p60_p3 }
  0x16   : > { %p2944_p9 = por %p196_p6, %p54_p1  ;;  %p202_p10 = scmp.eq.s32.totalorder %s2281_s28, 1 }
  0x17   : > { %s2949_s12 = scalar_select %p45_p7, %s2819_s23, %s47_s30  }
  0x18   : > { %p2951_p11 = por %p202_p10, %p60_p3  ;;  %p2282_p12 = scmp.ge.s32.totalorder %s2831_s26, 1 }
  0x19   : > { %3647 = sst [smem:[#allocation23_spill]] %s2949_s12  ;;  %p209_p13 = scmp.lt.s32.totalorder %s2831_s26, 3 }
  0x1a   : > { %s3649_s1 = sld [smem:[#allocation25_spill]]  ;;  %s2833_s18 = smov [#allocation5]  }
  0x1b   : > { %p2960_p0 = pnand %p2282_p12, %p209_p13  ;;  %s222_s19 = sshll.u32 %s2833_s18, 4  ;;  %s223_s19 = int_to_ptr.vmem [resolvable:$true] %s222_s19 }
  0x1c   : > { %s3651_s3 = sld [smem:[#allocation26_spill]]  ;;  %s2834_s30 = smov [#allocation7]  }
  0x1d   : > { %p2401_p1 = pneg %p2960_p0  ;;  %s239_s9 = sshll.u32 %s2834_s30, 4  ;;  %s240_s9 = int_to_ptr.vmem [resolvable:$true] %s239_s9 }
  0x1e   : > { %s2835_s14 = smov 64   ;;  %s2836_s15 = smov 4  }
  0x1f   : > { %p2402_p2 = pnand %p2401_p1, %p2932_p5  ;;  %p2285_p3 = scmp.ge.s32.totalorder %s2831_s26, 2 }
  0x20   : > { %s220_s16 = sshll.u32 %s3649_s1, 4  ;;  %s221_s16 = int_to_ptr.hbm [resolvable:$true] %s220_s16 }
  0x21   : > { %2404 = dma.hbm_to_vmem [thread:$0]  (!%p2402_p2), %s221_s16, 256, %s223_s19, [#allocation6], %s2835_s14, %s2835_s14, %s2836_s15  }
  0x22   : > { %s237_s28 = sshll.u32 %s3651_s3, 4  ;;  %252 = sbr.rel (%p2285_p3) target bundleno = 58 (0x3a), region = 32  ;;  %s238_s28 = int_to_ptr.hbm [resolvable:$true] %s237_s28 }
  0x23   : > { %2407 = dma.hbm_to_vmem [thread:$0]  (!%p2402_p2), %s238_s28, 256, %s240_s9, [#allocation6], %s2835_s14, %s2835_s14, %s2836_s15  }
  0x27   : > { %s2975_s18 = sand.u32 1, %s2819_s23   ;;  %s2361_s20 = sshll.u32 %s2827_s25, 4 }
  0x28   : > { %s2286_s27 = sshll.u32 %s2975_s18, 6  ;;  %s3652_s0 = sld [smem:[#allocation24_spill]] }
  0x29   : > { %s2378_s28 = scalar_select %p2928_p4, [#allocation0], [#allocation15] }
  0x2a   : > { %s260_s14 = scalar_lea.vmem [#allocation2], %s2286_s27  ;;  %s2837_s3 = smov 512  }
  0x2b   : > { %s283_s15 = sshll.u32 %s260_s14, 4  ;;  %s273_s1 = sld [smem:[%s2378_s28]]   ;;  %s284_s15 = int_to_ptr.vmem [resolvable:$true] %s283_s15 }
  0x2c   : > { %2379 = sst [smem:[#allocation12]] (%p2928_p4), %s2837_s3  ;;  %s2838_s29 = smov 256  }
  0x2d   : > { %2380 = sst [smem:[#allocation12 + $0x1]] (%p2928_p4), %s2838_s29  ;;  %s2839_s30 = smov 2  }
  0x2e   : > { %s268_s19 = scalar_lea.hbm %s3652_s0, %s2361_s20  ;;  %2381 = sst [smem:[#allocation12 + $0x2]] (%p2928_p4), %s2839_s30 }
  0x2f   : > { %s281_s9 = sshll.u32 %s268_s19, 4  ;;  %s2840_s20 = smov 128   ;;  %s282_s9 = int_to_ptr.hbm [resolvable:$true] %s281_s9 }
  0x30   : > { %2382 = sst [smem:[#allocation12 + $0x3]] (%p2928_p4), %s2840_s20  ;;  %s2841_s28 = smov 8  }
  0x31   : > { %s2289_s16 = sshll.u32 %s273_s1, 26  ;;  %2383 = sst [smem:[#allocation12 + $0x4]] (%p2928_p4), %s2840_s20 }
  0x32   : > { %s2290_s19 = sadd.s32 134217728, %s2289_s16  ;;  %2384 = sst [smem:[#allocation12 + $0x5]] (%p2928_p4), %s2841_s28 }
  0x33   : > { %s257_s14 = scalar_lea.sflag [#allocation3], %s2975_s18  ;;  %s2842_s0 = smov [#allocation11]  }
  0x34   : > { %2385 = dma.general (%p2928_p4), %s282_s9, 1024, %s284_s15, %s257_s14, %s2842_s0, [#allocation12], %s2290_s19, 0  }
  0x35   : > { %s2362_s3 = sshll.u32 %s2827_s25, 6  ;;  %s310_s29 = scalar_lea.vmem [#allocation8], %s2286_s27 }
  0x36   : > { %s318_s30 = sshll.u32 %s310_s29, 4  ;;  %s315_s1 = scalar_lea.hbm %s3631_s5, %s2362_s3  ;;  %s319_s30 = int_to_ptr.vmem [resolvable:$true] %s318_s30 }
  0x37   : > { %s316_s20 = sshll.u32 %s315_s1, 4  ;;  %s307_s16 = scalar_lea.sflag [#allocation9], %s2975_s18  ;;  %s317_s20 = int_to_ptr.hbm [resolvable:$true] %s316_s20 }
  0x38   : > { %s2843_s26 = smov 128   ;;  %s2844_s28 = smov 8  }
  0x39   : > { %2386 = dma.hbm_to_vmem [thread:$0]  (%p2928_p4), %s317_s20, 1024, %s319_s30, %s307_s16, %s2843_s26, %s2843_s26, %s2844_s28  }
  0x3a PF: > { %330 = sbr.rel (%p2960_p0) target bundleno = 1942 (0x796), region = 44  ;;  %s3009_s0 = sand.u32 (!%p2960_p0), 1, %s2815_s22  }
  0x3b   : > { %s3012_s23 = sshll.u32 (!%p2960_p0), %s3009_s0, 6  ;;  %s333_s12 = scalar_lea.sflag (!%p2960_p0), [#allocation3], %s3009_s0 }
  0x3c   : > { %s336_s27 = scalar_lea.vmem (!%p2960_p0), [#allocation2], %s3012_s23 }
  0x3f   : > { %2794 = dma.done.wait (%p2940_p8), %s333_s12, 1024  }
  0x40   : > { %2796 = vsyncadd (%p2940_p8), %s333_s12, 4294966272 }
  0x41   : > { %2798 = dma.done.wait (%p2932_p5), [#allocation6], 512  }
  0x42   : > { %2800 = vsyncadd (%p2932_p5), [#allocation6], 4294966784  ;;  %s353_s26 = scalar_lea.sflag [#allocation9], %s3009_s0  ;;  %s3026_s7 = scalar_lea.vmem [#allocation8], %s3012_s23 }
  0x43   : > { %2802 = dma.done.wait (%p2940_p8), %s353_s26, 1024  }
  0x44   : > { %2804 = vsyncadd (%p2940_p8), %s353_s26, 4294966272  ;;  %v2364_v0 = vld [vmem:[#allocation5 + $0x8] sm:$0xff]  ;;  %v2363_v1 = vld [vmem:[#allocation5] sm:$0xff]  ;;  %vm426_vm0 = vcmask 261120   ;;  %vm722_vm1 = vcmask 64512   ;;  %vm1083_vm2 = vcmask 130048  }
  0x45   : > { %v394_v2 = vld [vmem:[%s336_s27] sm:$0xff]  ;;  %v395_v3 = vld [vmem:[%s336_s27 + $0x8] sm:$0xff]  ;;  %v396_v4 = vld [vmem:[%s336_s27 + $0x10] sm:$0xff]  ;;  %445 = vmatpush.bf16.msra.mxu0 %v2364_v0  ;;  %2368 = vmatpush.bf16.msra.mxu1 %v2364_v0  ;;  %s390_s9 = scalar_lea.vmem [#allocation10], %s3012_s23  ;;  %s2110_s15 = scalar_lea.sflag [#allocation4], %s3009_s0 }
  0x46   : > { %v397_v5 = vld [vmem:[%s336_s27 + $0x18] sm:$0xff]  ;;  %v398_v6 = vld [vmem:[%s336_s27 + $0x20] sm:$0xff]  ;;  %v399_v7 = vld [vmem:[%s336_s27 + $0x28] sm:$0xff]  ;;  %2369 = vmatpush.bf16.msra.mxu2 %v2364_v0  ;;  %2370 = vmatpush.bf16.msra.mxu3 %v2364_v0  ;;  %v402_v10 = vpack.c.bf16 %v395_v3, %v394_v2 }
  0x47   : > { %v400_v8 = vld [vmem:[%s336_s27 + $0x30] sm:$0xff]  ;;  %v401_v9 = vld [vmem:[%s336_s27 + $0x38] sm:$0xff]  ;;  %v403_v11 = vpack.c.bf16 %v397_v5, %v396_v4  ;;  %v404_v12 = vpack.c.bf16 %v399_v7, %v398_v6  ;;  %v2551_v15 = vld [vmem:[%s3628_s2] ss:$0 sm:$0xff] }
  0x48   : > { %v405_v13 = vpack.c.bf16 %v401_v9, %v400_v8 }
  0x49   : > { %446 = vmatpush.bf16.msra.mxu0 %v2363_v1  ;;  %2371 = vmatpush.bf16.msra.mxu1 %v2363_v1 }
  0x4a   : > { %2372 = vmatpush.bf16.msra.mxu2 %v2363_v1  ;;  %2373 = vmatpush.bf16.msra.mxu3 %v2363_v1 }
  0x4c   : > { %2308 = vmatmul.msk.bf16.vlgmr.msra.gmra.mxu0 %vm426_vm0, %v402_v10  ;;  %2309 = vmatmul.msk.bf16.vlgmr.msra.gmra.mxu1 %vm426_vm0, %v403_v11 }
  0x4d   : > { %2310 = vmatmul.msk.bf16.vlgmr.msra.gmra.mxu2 %vm426_vm0, %v404_v12  ;;  %2311 = vmatmul.msk.bf16.vlgmr.msra.gmra.mxu3 %vm426_vm0, %v405_v13 }
  0xc9   : > { %v448_v14 = vpop.f32.mrf.mxu0  ;;  %v453_v19 = vpop.f32.mrf.mxu1 }
  0xca   : > { %v449_v17 = vadd.f32 %v2551_v15, %v448_v14  ;;  %v454_v22 = vadd.f32 %v2551_v15, %v453_v19 }
  0xd0   : > { %v458_v24 = vpop.f32.mrf.mxu2  ;;  %v463_v29 = vpop.f32.mrf.mxu3 }
  0xd1   : > { %v450_v16 = vpop.f32.mrf.mxu0  ;;  %v455_v21 = vpop.f32.mrf.mxu1  ;;  %v459_v27 = vadd.f32 %v2551_v15, %v458_v24  ;;  %v464_v32 = vadd.f32 %v2551_v15, %v463_v29 }
  0xd2   : > { %v451_v18 = vadd.f32 %v2551_v15, %v450_v16  ;;  %v456_v23 = vadd.f32 %v2551_v15, %v455_v21 }
  0xd4   : > { %v468_v20 = vpack.c.bf16 %v451_v18, %v449_v17  ;;  %v469_v25 = vpack.c.bf16 %v456_v23, %v454_v22 }
  0xd6   : > { %472 = vxpose.xlu0.c.b16.start [1/4] (short) (narrow) %v468_v20, 96 }
  0xd8   : > { %v460_v26 = vpop.f32.mrf.mxu2  ;;  %v465_v31 = vpop.f32.mrf.mxu3 }
  0xd9   : > { %v461_v28 = vadd.f32 %v2551_v15, %v460_v26  ;;  %v466_v33 = vadd.f32 %v2551_v15, %v465_v31 }
  0xdb   : > { %v470_v30 = vpack.c.bf16 %v461_v28, %v459_v27  ;;  %v471_v34 = vpack.c.bf16 %v466_v33, %v464_v32 }
  0xe6   : > { %473 = vxpose.xlu0.c.b16.cont [2/4] (short) (narrow) %v469_v25, 96 }
  0xf6   : > { %474 = vxpose.xlu0.c.b16.cont [3/4] (short) (narrow) %v470_v30, 96 }
 0x106   : > { %475 = vxpose.xlu0.c.b16.end [4/4] (short) (narrow) %v471_v34, 96 }
 0x182   : > { %v480_v35 = vpop.trf.xlu0 }
 0x183   : > { %v494_v37 = vunpack.c.l.b16 %v480_v35  ;;  %v495_v47 = vunpack.c.h.b16 %v480_v35  ;;  %v1043_v35 = vld [vmem:[%s3026_s7] sm:$0xff] }
 0x185   : > { %v506_v40 = vpack.c.b16 %v494_v37, %v494_v37  ;;  %v507_v49 = vpack.c.b16 %v495_v47, %v495_v47 }
 0x192   : > { %v481_v36 = vpop.trf.xlu0 }
 0x193   : > { %v496_v42 = vunpack.c.l.b16 %v481_v36  ;;  %v497_v52 = vunpack.c.h.b16 %v481_v36 }
 0x195   : > { %v508_v45 = vpack.c.b16 %v496_v42, %v496_v42  ;;  %v509_v54 = vpack.c.b16 %v497_v52, %v497_v52 }
 0x1a2   : > { %v482_v38 = vpop.trf.xlu0 }
 0x1a3   : > { %v498_v39 = vunpack.c.l.b16 %v482_v38  ;;  %v499_v48 = vunpack.c.h.b16 %v482_v38 }
 0x1a5   : > { %v510_v41 = vpack.c.b16 %v498_v39, %v498_v39  ;;  %v511_v50 = vpack.c.b16 %v499_v48, %v499_v48 }
 0x1a7   : > { %2485 = vxpose.binary.xlu1.c.b16.start.end [1/2] (short) (narrow) %v506_v40, %v510_v41, 64  ;;  %v1044_v40 = vld [vmem:[%s3026_s7 + $0x8] sm:$0xff] }
 0x1b2   : > { %v483_v43 = vpop.trf.xlu0 }
 0x1b3   : > { %v500_v44 = vunpack.c.l.b16 %v483_v43  ;;  %v501_v51 = vunpack.c.h.b16 %v483_v43 }
 0x1b5   : > { %v512_v46 = vpack.c.b16 %v500_v44, %v500_v44  ;;  %v513_v53 = vpack.c.b16 %v501_v51, %v501_v51 }
 0x1b7   : > { %2503 = vxpose.binary.xlu2.c.b16.start.end [1/2] (short) (narrow) %v508_v45, %v512_v46, 64 }
 0x1e7   : > { %2494 = vxpose.binary.xlu1.c.b16.start.end [1/2] (short) (narrow) %v507_v49, %v511_v50, 64 }
 0x1f7   : > { %2512 = vxpose.binary.xlu2.c.b16.start.end [1/2] (short) (narrow) %v509_v54, %v513_v53, 64 }
 0x253   : > { %v2486_v55 = vpop.trf.xlu1 }
 0x254   : > { %v727_v56 = vsel %vm722_vm1, %v2486_v55, 0 }
 0x255   : > { %736 = vmatpush.bf16.xpose.msrb.mxu1 %v727_v56 }
 0x258   : > { %v2504_v60 = vpop.trf.xlu2 }
 0x259   : > { %v887_v14 = vsel %vm722_vm1, %v2504_v60, 0 }
 0x25b   : > { %v2487_v57 = vpop.trf.xlu1 }
 0x25c   : > { %2312 = vmatmul.msk.bf16.vlgmr.msrb.gmra.mxu1 %vm722_vm1, %v2487_v57 }
 0x260   : > { %v2505_v62 = vpop.trf.xlu2 }
 0x263   : > { %v2488_v58 = vpop.trf.xlu1 }
 0x264   : > { %v747_v59 = vsel %vm722_vm1, %v2488_v58, 0 }
 0x265   : > { %756 = vmatpush.bf16.xpose.msrb.mxu2 %v747_v59  ;;  %v1045_v59 = vld [vmem:[%s3026_s7 + $0x10] sm:$0xff] }
 0x268   : > { %v2506_v1 = vpop.trf.xlu2 }
 0x269   : > { %v907_v22 = vsel %vm722_vm1, %v2506_v1, 0 }
 0x26b   : > { %v2489_v61 = vpop.trf.xlu1 }
 0x26c   : > { %2313 = vmatmul.msk.bf16.vlgmr.msrb.gmra.mxu2 %vm722_vm1, %v2489_v61 }
 0x270   : > { %v2507_v3 = vpop.trf.xlu2 }
 0x273   : > { %v2490_v63 = vpop.trf.xlu1 }
 0x274   : > { %v767_v0 = vsel %vm722_vm1, %v2490_v63, 0 }
 0x275   : > { %776 = vmatpush.bf16.xpose.msrb.mxu3 %v767_v0  ;;  %v1046_v0 = vld [vmem:[%s3026_s7 + $0x18] sm:$0xff] }
 0x278   : > { %v2508_v6 = vpop.trf.xlu2 }
 0x279   : > { %v927_v29 = vsel %vm722_vm1, %v2508_v6, 0 }
 0x27b   : > { %v2491_v2 = vpop.trf.xlu1 }
 0x27c   : > { %2314 = vmatmul.msk.bf16.vlgmr.msrb.gmra.mxu3 %vm722_vm1, %v2491_v2 }
 0x280   : > { %v2509_v8 = vpop.trf.xlu2 }
 0x283   : > { %v2492_v4 = vpop.trf.xlu1 }
 0x284   : > { %v787_v5 = vsel %vm722_vm1, %v2492_v4, 0 }
 0x285   : > { %796 = vmatpush.bf16.xpose.msra.mxu1 %v787_v5 }
 0x288   : > { %v2510_v11 = vpop.trf.xlu2 }
 0x289   : > { %v947_v18 = vsel %vm722_vm1, %v2510_v11, 0  ;;  %v3116_v11 = vld [vmem:[%s3026_s7 + $0x30] sm:$0xff] }
 0x28b   : > { %v2493_v7 = vpop.trf.xlu1 }
 0x28c   : > { %2315 = vmatmul.msk.bf16.vlgmr.msra.gmra.mxu1 %vm722_vm1, %v2493_v7 }
 0x290   : > { %v2511_v13 = vpop.trf.xlu2 }
 0x293   : > { %v2495_v9 = vpop.trf.xlu1 }
 0x294   : > { %v807_v10 = vsel %vm722_vm1, %v2495_v9, 0 }
 0x295   : > { %816 = vmatpush.bf16.xpose.msra.mxu2 %v807_v10 }
 0x298   : > { %v2513_v17 = vpop.trf.xlu2 }
 0x299   : > { %v967_v19 = vsel %vm722_vm1, %v2513_v17, 0 }
 0x29a   : > { %976 = vmatpush.bf16.xpose.msrb.mxu0 %v967_v19 }
 0x29b   : > { %v2496_v12 = vpop.trf.xlu1 }
 0x29c   : > { %2316 = vmatmul.msk.bf16.vlgmr.msra.gmra.mxu2 %vm722_vm1, %v2496_v12 }
 0x2a0   : > { %v2514_v21 = vpop.trf.xlu2 }
 0x2a1   : > { %2324 = vmatmul.msk.bf16.vlgmr.msrb.gmra.mxu0 %vm722_vm1, %v2514_v21 }
 0x2a3   : > { %v2497_v15 = vpop.trf.xlu1 }
 0x2a4   : > { %v827_v16 = vsel %vm722_vm1, %v2497_v15, 0 }
 0x2a5   : > { %836 = vmatpush.bf16.xpose.msra.mxu3 %v827_v16 }
 0x2a8   : > { %v2515_v25 = vpop.trf.xlu2 }
 0x2a9   : > { %v987_v27 = vsel %vm722_vm1, %v2515_v25, 0 }
 0x2ab   : > { %v2498_v20 = vpop.trf.xlu1 }
 0x2ac   : > { %2317 = vmatmul.msk.bf16.vlgmr.msra.gmra.mxu3 %vm722_vm1, %v2498_v20 }
 0x2ad   : > { %896 = vmatpush.bf16.xpose.msrb.mxu3 %v887_v14 }
 0x2b0   : > { %v2516_v28 = vpop.trf.xlu2 }
 0x2b3   : > { %v2499_v23 = vpop.trf.xlu1 }
 0x2b4   : > { %v847_v24 = vsel %vm722_vm1, %v2499_v23, 0 }
 0x2b5   : > { %956 = vmatpush.bf16.xpose.msra.mxu3 %v947_v18  ;;  %856 = vmatpush.bf16.xpose.msrb.mxu1 %v847_v24  ;;  %v484_v18 = vpop.trf.xlu0 }
 0x2b8   : > { %v2517_v32 = vpop.trf.xlu2 }
 0x2b9   : > { %v1007_v34 = vsel %vm722_vm1, %v2517_v32, 0 }
 0x2bb   : > { %v2500_v26 = vpop.trf.xlu1 }
 0x2bc   : > { %2318 = vmatmul.msk.bf16.vlgmr.msrb.gmra.mxu1 %vm722_vm1, %v2500_v26  ;;  %2320 = vmatmul.msk.bf16.vlgmr.msrb.gmra.mxu3 %vm722_vm1, %v2505_v62  ;;  %v3135_v26 = vld [vmem:[%s3026_s7 + $0x38] sm:$0xff] }
 0x2bd   : > { %916 = vmatpush.bf16.xpose.msra.mxu1 %v907_v22  ;;  %v3129_v19 = vpop.trf.xlu0 }
 0x2c0   : > { %v2518_v38 = vpop.trf.xlu2 }
 0x2c3   : > { %v2501_v30 = vpop.trf.xlu1 }
 0x2c4   : > { %v867_v31 = vsel %vm722_vm1, %v2501_v30, 0 }
 0x2c5   : > { %996 = vmatpush.bf16.xpose.msrb.mxu1 %v987_v27  ;;  %876 = vmatpush.bf16.xpose.msrb.mxu2 %v867_v31 }
 0x2c8   : > { %v2519_v43 = vpop.trf.xlu2 }
 0x2c9   : > { %v1027_v45 = vsel %vm722_vm1, %v2519_v43, 0 }
 0x2ca   : > { %1036 = vmatpush.bf16.xpose.msrb.mxu3 %v1027_v45 }
 0x2cb   : > { %v2502_v33 = vpop.trf.xlu1 }
 0x2cc   : > { %2319 = vmatmul.msk.bf16.vlgmr.msrb.gmra.mxu2 %vm722_vm1, %v2502_v33  ;;  %2321 = vmatmul.msk.bf16.vlgmr.msra.gmra.mxu1 %vm722_vm1, %v2507_v3 }
 0x2cd   : > { %936 = vmatpush.bf16.xpose.msra.mxu2 %v927_v29  ;;  %2323 = vmatmul.msk.bf16.vlgmr.msra.gmra.mxu3 %vm722_vm1, %v2511_v13 }
 0x2d0   : > { %v2520_v46 = vpop.trf.xlu2 }
 0x2d5   : > { %1016 = vmatpush.bf16.xpose.msrb.mxu2 %v1007_v34 }
 0x2d9   : > { %v738_v36 = vpop.f32.mrf.mxu1 }
 0x2da   : > { %v3067_v37 = vadd.f32 %v1043_v35, %v738_v36 }
 0x2dc   : > { %v1084_v39 = vsel %vm1083_vm2, %v3067_v37, -inf  ;;  %2322 = vmatmul.msk.bf16.vlgmr.msra.gmra.mxu2 %vm722_vm1, %v2509_v8  ;;  %2325 = vmatmul.msk.bf16.vlgmr.msrb.gmra.mxu1 %vm722_vm1, %v2516_v28 }
 0x2dd   : > { %1085 = vmax.xlane.f32.xlu0 %v1084_v39  ;;  %2327 = vmatmul.msk.bf16.vlgmr.msrb.gmra.mxu3 %vm722_vm1, %v2520_v46  ;;  %v502_v39 = vunpack.c.l.b16 %v484_v18 }
 0x2e1   : > { %v740_v41 = vpop.f32.mrf.mxu1 }
 0x2e2   : > { %v3074_v42 = vadd.f32 %v1044_v40, %v740_v41 }
 0x2e4   : > { %v1087_v44 = vsel %vm1083_vm2, %v3074_v42, -inf }
 0x2e5   : > { %1088 = vmax.xlane.f32.xlu1 %v1087_v44 }
 0x2ec   : > { %2326 = vmatmul.msk.bf16.vlgmr.msrb.gmra.mxu2 %vm722_vm1, %v2518_v38 }
 0x2ef   : > { %v758_v47 = vpop.f32.mrf.mxu2 }
 0x2f0   : > { %v3081_v48 = vadd.f32 %v1043_v35, %v758_v47 }
 0x2f2   : > { %v1090_v49 = vsel %vm1083_vm2, %v3081_v48, -inf }
 0x2f3   : > { %1091 = vmax.xlane.f32.xlu2 %v1090_v49 }
 0x2f7   : > { %v760_v50 = vpop.f32.mrf.mxu2 }
 0x2f8   : > { %v3085_v51 = vadd.f32 %v1044_v40, %v760_v50  ;;  %v1047_v50 = vld [vmem:[%s3026_s7 + $0x20] sm:$0xff] }
 0x2fa   : > { %v1093_v52 = vsel %vm1083_vm2, %v3085_v51, -inf }
 0x2fb   : > { %1094 = vmax.xlane.f32.xlu0 %v1093_v52 }
 0x2ff   : > { %v778_v53 = vpop.f32.mrf.mxu3 }
 0x300   : > { %v3089_v54 = vadd.f32 %v1043_v35, %v778_v53  ;;  %v1048_v53 = vld [vmem:[%s3026_s7 + $0x28] sm:$0xff] }
 0x302   : > { %v1096_v55 = vsel %vm1083_vm2, %v3089_v54, -inf }
 0x303   : > { %1097 = vmax.xlane.f32.xlu0 %v1096_v55 }
 0x307   : > { %v780_v56 = vpop.f32.mrf.mxu3 }
 0x308   : > { %v3093_v57 = vadd.f32 %v1044_v40, %v780_v56 }
 0x309   : > { %v798_v62 = vpop.f32.mrf.mxu1 }
 0x30a   : > { %v1099_v58 = vsel %vm1083_vm2, %v3093_v57, -inf  ;;  %v3103_v1 = vadd.f32 %v1043_v35, %v798_v62 }
 0x30b   : > { %1100 = vmax.xlane.f32.xlu1 %v1099_v58 }
 0x30c   : > { %v1102_v4 = vsel %vm1083_vm2, %v3103_v1, -inf }
 0x311   : > { %v800_v6 = vpop.f32.mrf.mxu1 }
 0x312   : > { %v3111_v7 = vadd.f32 %v1044_v40, %v800_v6  ;;  %v503_v40 = vunpack.c.h.b16 %v484_v18 }
 0x314   : > { %v1105_v13 = vsel %vm1083_vm2, %v3111_v7, -inf  ;;  %v515_v46 = vpack.c.b16 %v503_v40, %v503_v40 }
 0x31e   : > { %v978_v10 = vpop.f32.mrf.mxu0 }
 0x31f   : > { %v818_v60 = vpop.f32.mrf.mxu2  ;;  %v3119_v12 = vadd.f32 %v3116_v11, %v978_v10 }
 0x320   : > { %v3098_v61 = vadd.f32 %v1045_v59, %v818_v60 }
 0x322   : > { %v1108_v63 = vsel %vm1083_vm2, %v3098_v61, -inf }
 0x323   : > { %1109 = vmax.xlane.f32.xlu0 %v1108_v63 }
 0x326   : > { %v980_v25 = vpop.f32.mrf.mxu0 }
 0x327   : > { %v820_v2 = vpop.f32.mrf.mxu2  ;;  %v3140_v28 = vadd.f32 %v3135_v26, %v980_v25 }
 0x328   : > { %v3105_v3 = vadd.f32 %v1046_v0, %v820_v2 }
 0x329   : > { %v1159_v34 = vsel %vm1083_vm2, %v3140_v28, -inf }
 0x32a   : > { %v1111_v5 = vsel %vm1083_vm2, %v3105_v3, -inf }
 0x32b   : > { %1103 = vmax.xlane.f32.xlu0 %v1102_v4  ;;  %1112 = vmax.xlane.f32.xlu1 %v1111_v5 }
 0x32f   : > { %v838_v8 = vpop.f32.mrf.mxu3 }
 0x330   : > { %v3113_v9 = vadd.f32 %v1045_v59, %v838_v8 }
 0x332   : > { %v1114_v14 = vsel %vm1083_vm2, %v3113_v9, -inf }
 0x333   : > { %1106 = vmax.xlane.f32.xlu1 %v1105_v13  ;;  %1115 = vmax.xlane.f32.xlu0 %v1114_v14 }
 0x337   : > { %v840_v15 = vpop.f32.mrf.mxu3 }
 0x338   : > { %v3125_v16 = vadd.f32 %v1046_v0, %v840_v15 }
 0x339   : > { %v858_v21 = vpop.f32.mrf.mxu1 }
 0x33a   : > { %v1117_v17 = vsel %vm1083_vm2, %v3125_v16, -inf  ;;  %v3149_v41 = vadd.f32 %v1045_v59, %v858_v21 }
 0x33b   : > { %1118 = vmax.xlane.f32.xlu2 %v1117_v17 }
 0x33c   : > { %v1120_v49 = vsel %vm1083_vm2, %v3149_v41, -inf }
 0x33f   : > { %v898_v31 = vpop.f32.mrf.mxu3 }
 0x341   : > { %v860_v36 = vpop.f32.mrf.mxu1 }
 0x342   : > { %v3151_v43 = vadd.f32 %v1046_v0, %v860_v36 }
 0x344   : > { %v1123_v47 = vsel %vm1083_vm2, %v3151_v43, -inf }
 0x347   : > { %v900_v52 = vpop.f32.mrf.mxu3 }
 0x348   : > { %v3169_v60 = vadd.f32 %v1048_v53, %v900_v52 }
 0x349   : > { %v918_v10 = vpop.f32.mrf.mxu1 }
 0x34a   : > { %v1135_v4 = vsel %vm1083_vm2, %v3169_v60, -inf  ;;  %v3189_v17 = vadd.f32 %v1047_v50, %v918_v10  ;;  %v504_v10 = vunpack.c.l.b16 %v3129_v19 }
 0x34c   : > { %v1138_v21 = vsel %vm1083_vm2, %v3189_v17, -inf }
 0x34f   : > { %v878_v20 = vpop.f32.mrf.mxu2 }
 0x350   : > { %v3131_v22 = vadd.f32 %v1045_v59, %v878_v20  ;;  %v1086_v23 = vpop.xlane.xlu0 %1085  ;;  %v3167_v59 = vadd.f32 %v1047_v50, %v898_v31  ;;  %v958_v20 = vpop.f32.mrf.mxu3 }
 0x351   : > { %v1180_v24 = vsub.f32 %v3067_v37, %v1086_v23 }
 0x352   : > { %v1126_v27 = vsel %vm1083_vm2, %v3131_v22, -inf  ;;  %v1132_v5 = vsel %vm1083_vm2, %v3167_v59, -inf }
 0x353   : > { %1127 = vmax.xlane.f32.xlu1 %v1126_v27  ;;  %v1212_v29 = vmul.f32 1.442695, %v1180_v24  ;;  %v920_v24 = vpop.f32.mrf.mxu1  ;;  %v3200_v27 = vadd.f32 %v1047_v50, %v958_v20 }
 0x354   : > { %v3198_v25 = vadd.f32 %v1048_v53, %v920_v24 }
 0x355   : > { %2553 = vpow2.f32 %v1212_v29 }
 0x356   : > { %v1141_v31 = vsel %vm1083_vm2, %v3198_v25, -inf }
 0x357   : > { %v880_v30 = vpop.f32.mrf.mxu2 }
 0x358   : > { %v3142_v32 = vadd.f32 %v1046_v0, %v880_v30  ;;  %v1089_v33 = vpop.xlane.xlu1 %1088  ;;  %v960_v29 = vpop.f32.mrf.mxu3  ;;  %v1150_v30 = vsel %vm1083_vm2, %v3200_v27, -inf }
 0x359   : > { %v1181_v35 = vsub.f32 %v3074_v42, %v1089_v33  ;;  %v514_v42 = vpack.c.b16 %v502_v39, %v502_v39 }
 0x35a   : > { %v1129_v37 = vsel %vm1083_vm2, %v3142_v32, -inf }
 0x35b   : > { %v1214_v38 = vmul.f32 1.442695, %v1181_v35  ;;  %1130 = vmax.xlane.f32.xlu0 %v1129_v37  ;;  %1160 = vmax.xlane.f32.xlu1 %v1159_v34  ;;  %v3153_v44 = vpop.eup %2553  ;;  %v3206_v34 = vadd.f32 %v1048_v53, %v960_v29  ;;  %v998_v36 = vpop.f32.mrf.mxu1 }
 0x35c   : > { %v1404_v55 = vpack.c.bf16 %v3153_v44, %v3153_v44  ;;  %v3216_v40 = vadd.f32 %v3116_v11, %v998_v36 }
 0x35d   : > { %2555 = vpow2.f32 %v1214_v38  ;;  %v1153_v37 = vsel %vm1083_vm2, %v3206_v34, -inf }
 0x35e   : > { %v3171_v62 = vunpack.c.l.b16 %v1404_v55 }
 0x35f   : > { %v938_v45 = vpop.f32.mrf.mxu2 }
 0x360   : > { %v3181_v6 = vadd.f32 %v1047_v50, %v938_v45  ;;  %v1038_v39 = vpop.f32.mrf.mxu3 }
 0x361   : > { %v3219_v45 = vadd.f32 %v3116_v11, %v1038_v39 }
 0x362   : > { %v1144_v14 = vsel %vm1083_vm2, %v3181_v6, -inf }
 0x363   : > { %v3163_v56 = vpop.eup %2555  ;;  %1124 = vmax.xlane.f32.xlu0 %v1123_v47  ;;  %1121 = vmax.xlane.f32.xlu1 %v1120_v49  ;;  %v1000_v47 = vpop.f32.mrf.mxu1 }
 0x364   : > { %v1405_v58 = vpack.c.bf16 %v3163_v56, %v3163_v56  ;;  %2521 = vxpose.binary.xlu2.c.b16.start.end [1/2] (short) (narrow) %v515_v46, %v514_v42, 64  ;;  %v1162_v42 = vsel %vm1083_vm2, %v3216_v40, -inf  ;;  %v1174_v46 = vsel %vm1083_vm2, %v3219_v45, -inf  ;;  %v3226_v49 = vadd.f32 %v3135_v26, %v1000_v47 }
 0x366   : > { %v3173_v63 = vunpack.c.l.b16 %v1405_v58  ;;  %v1165_v50 = vsel %vm1083_vm2, %v3226_v49, -inf }
 0x367   : > { %v940_v0 = vpop.f32.mrf.mxu2 }
 0x368   : > { %v3183_v8 = vadd.f32 %v1048_v53, %v940_v0  ;;  %v1040_v52 = vpop.f32.mrf.mxu3  ;;  %v1276_v0 = vsel %vm1083_vm2, %v3153_v44, 0.0 }
 0x36a   : > { %v1147_v13 = vsel %vm1083_vm2, %v3183_v8, -inf }
 0x36b   : > { %1136 = vmax.xlane.f32.xlu0 %v1135_v4  ;;  %1133 = vmax.xlane.f32.xlu1 %v1132_v5 }
 0x36e   : > { %v3233_v53 = vpop.xlane.xlu0 %1094 }
 0x36f   : > { %v1018_v15 = vpop.f32.mrf.mxu2 }
 0x370   : > { %v3192_v18 = vadd.f32 %v3116_v11, %v1018_v15  ;;  %v3231_v11 = vadd.f32 %v3135_v26, %v1040_v52  ;;  %v516_v15 = vpack.c.b16 %v504_v10, %v504_v10 }
 0x372   : > { %v1168_v23 = vsel %vm1083_vm2, %v3192_v18, -inf  ;;  %v1177_v55 = vsel %vm1083_vm2, %v3231_v11, -inf }
 0x373   : > { %1148 = vmax.xlane.f32.xlu0 %v1147_v13  ;;  %1145 = vmax.xlane.f32.xlu1 %v1144_v14  ;;  %v505_v13 = vunpack.c.h.b16 %v3129_v19 }
 0x375   : > { %v517_v20 = vpack.c.b16 %v505_v13, %v505_v13 }
 0x376   : > { %v3237_v58 = vpop.xlane.xlu0 %1097 }
 0x377   : > { %v1020_v33 = vpop.f32.mrf.mxu2 }
 0x378   : > { %v3209_v35 = vadd.f32 %v3135_v26, %v1020_v33  ;;  %v1279_v26 = vsel %vm1083_vm2, %v3163_v56, 0.0 }
 0x37a   : > { %v1171_v38 = vsel %vm1083_vm2, %v3209_v35, -inf }
 0x37b   : > { %1139 = vmax.xlane.f32.xlu1 %v1138_v21  ;;  %1169 = vmax.xlane.f32.xlu0 %v1168_v23 }
 0x37e   : > { %v3241_v4 = vpop.xlane.xlu1 %1100 }
 0x383   : > { %1151 = vmax.xlane.f32.xlu1 %v1150_v30  ;;  %1142 = vmax.xlane.f32.xlu0 %v1141_v31 }
 0x38b   : > { %1154 = vmax.xlane.f32.xlu0 %v1153_v37  ;;  %1172 = vmax.xlane.f32.xlu1 %v1171_v38 }
 0x393   : > { %1163 = vmax.xlane.f32.xlu0 %v1162_v42  ;;  %1175 = vmax.xlane.f32.xlu1 %v1174_v46 }
 0x396   : > { %v3243_v5 = vpop.xlane.xlu0 %1109 }
 0x39b   : > { %1166 = vmax.xlane.f32.xlu1 %v1165_v50 }
 0x39e   : > { %v3249_v14 = vpop.xlane.xlu1 %1112  ;;  %v1104_v21 = vpop.xlane.xlu0 %1103 }
 0x3a3   : > { %1178 = vmax.xlane.f32.xlu1 %v1177_v55 }
 0x3a6   : > { %v3251_v44 = vpop.xlane.xlu1 %1106  ;;  %v3253_v23 = vpop.xlane.xlu0 %1115 }
 0x3ab   : > { %1277 = vadd.xlane.f32.xlu1 %v1276_v0 }
 0x3b3   : > { %1280 = vadd.xlane.f32.xlu1 %v1279_v26 }
 0x3bc   : > { %2530 = vxpose.binary.xlu0.c.b16.start.end [1/2] (short) (narrow) %v517_v20, %v516_v15, 64 }
 0x3c6   : > { %v3255_v24 = vpop.xlane.xlu1 %1127 }
 0x3ce   : > { %v3257_v29 = vpop.xlane.xlu1 %1160  ;;  %v3259_v56 = vpop.xlane.xlu0 %1130 }
 0x3d6   : > { %v3261_v30 = vpop.xlane.xlu1 %1121  ;;  %v3263_v31 = vpop.xlane.xlu0 %1124 }
 0x3de   : > { %v1134_v19 = vpop.xlane.xlu1 %1133  ;;  %v1137_v33 = vpop.xlane.xlu0 %1136 }
 0x3df   : > { %v1196_v36 = vsub.f32 %v3167_v59, %v1134_v19  ;;  %v1197_v37 = vsub.f32 %v3169_v60, %v1137_v33 }
 0x3e1   : > { %v1244_v38 = vmul.f32 1.442695, %v1196_v36  ;;  %v1246_v39 = vmul.f32 1.442695, %v1197_v37 }
 0x3e3   : > { %2557 = vpow2.f32 %v1244_v38 }
 0x3e4   : > { %2559 = vpow2.f32 %v1246_v39 }
 0x3e6   : > { %v1146_v42 = vpop.xlane.xlu1 %1145  ;;  %v1149_v46 = vpop.xlane.xlu0 %1148 }
 0x3e7   : > { %v1200_v47 = vsub.f32 %v3181_v6, %v1146_v42  ;;  %v1201_v50 = vsub.f32 %v3183_v8, %v1149_v46  ;;  %v1092_v42 = vpop.xlane.xlu2 %1091 }
 0x3e9   : > { %v3269_v52 = vpop.eup %2557  ;;  %v1252_v55 = vmul.f32 1.442695, %v1200_v47  ;;  %v1254_v0 = vmul.f32 1.442695, %v1201_v50 }
 0x3ea   : > { %v3271_v26 = vpop.eup %2559  ;;  %v1420_v59 = vpack.c.bf16 %v3269_v52, %v3269_v52 }
 0x3eb   : > { %v1421_v60 = vpack.c.bf16 %v3271_v26, %v3271_v26  ;;  %2561 = vpow2.f32 %v1252_v55 }
 0x3ec   : > { %v3277_v10 = vunpack.c.l.b16 %v1420_v59  ;;  %2563 = vpow2.f32 %v1254_v0 }
 0x3ed   : > { %v3279_v13 = vunpack.c.l.b16 %v1421_v60 }
 0x3ee   : > { %v1140_v6 = vpop.xlane.xlu1 %1139  ;;  %v1170_v8 = vpop.xlane.xlu0 %1169 }
 0x3ef   : > { %v1198_v20 = vsub.f32 %v3189_v17, %v1140_v6  ;;  %v1208_v55 = vsub.f32 %v3192_v18, %v1170_v8  ;;  %v1186_v6 = vsub.f32 %v3103_v1, %v1104_v21  ;;  %v3304_v15 = vpop.xlane.xlu2 %1118  ;;  %v1189_v18 = vsub.f32 %v3105_v3, %v3249_v14 }
 0x3f1   : > { %v3284_v19 = vpop.eup %2561  ;;  %v1248_v39 = vmul.f32 1.442695, %v1198_v20 }
 0x3f2   : > { %v3286_v33 = vpop.eup %2563  ;;  %v1424_v36 = vpack.c.bf16 %v3284_v19, %v3284_v19 }
 0x3f3   : > { %v1425_v37 = vpack.c.bf16 %v3286_v33, %v3286_v33  ;;  %2565 = vpow2.f32 %v1248_v39 }
 0x3f4   : > { %v3292_v38 = vunpack.c.l.b16 %v1424_v36  ;;  %v1268_v36 = vmul.f32 1.442695, %v1208_v55  ;;  %v1230_v55 = vmul.f32 1.442695, %v1189_v18 }
 0x3f5   : > { %v3294_v46 = vunpack.c.l.b16 %v1425_v37  ;;  %v1183_v37 = vsub.f32 %v3085_v51, %v3233_v53  ;;  %v1188_v51 = vsub.f32 %v3098_v61, %v3243_v5  ;;  %v1156_v5 = vsel %vm1083_vm2, %v3119_v12, -inf }
 0x3f6   : > { %v1152_v47 = vpop.xlane.xlu1 %1151  ;;  %v1143_v50 = vpop.xlane.xlu0 %1142 }
 0x3f7   : > { %v1660_v17 = vpack.c.b16 %v3294_v46, %v3292_v38  ;;  %v1199_v0 = vsub.f32 %v3198_v25, %v1143_v50  ;;  %v1202_v59 = vsub.f32 %v3200_v27, %v1152_v47  ;;  %v1224_v25 = vmul.f32 1.442695, %v1186_v6 }
 0x3f8   : > { %v1182_v27 = vsub.f32 %v3081_v48, %v1092_v42  ;;  %v1218_v53 = vmul.f32 1.442695, %v1183_v37  ;;  %v1228_v61 = vmul.f32 1.442695, %v1188_v51 }
 0x3f9   : > { %v1250_v60 = vmul.f32 1.442695, %v1199_v0  ;;  %v1256_v20 = vmul.f32 1.442695, %v1202_v59  ;;  %v3306_v2 = vpop.eup %2565 }
 0x3fa   : > { %v1422_v47 = vpack.c.bf16 %v3306_v2, %v3306_v2  ;;  %v1216_v48 = vmul.f32 1.442695, %v1182_v27 }
 0x3fb   : > { %2567 = vpow2.f32 %v1250_v60 }
 0x3fc   : > { %2569 = vpow2.f32 %v1268_v36  ;;  %v3327_v0 = vunpack.c.l.b16 %v1422_v47  ;;  %v1185_v47 = vsub.f32 %v3093_v57, %v3241_v4  ;;  %v1184_v57 = vsub.f32 %v3089_v54, %v3237_v58 }
 0x3fd   : > { %2571 = vpow2.f32 %v1256_v20 }
 0x3fe   : > { %v1173_v8 = vpop.xlane.xlu1 %1172  ;;  %v1155_v39 = vpop.xlane.xlu0 %1154  ;;  %2573 = vpow2.f32 %v1224_v25  ;;  %v3653_v25 = vpack.c.b16 %v3173_v63, %v3171_v62  ;;  %v1220_v58 = vmul.f32 1.442695, %v1184_v57  ;;  %v1187_v57 = vsub.f32 %v3111_v7, %v3251_v44 }
 0x3ff   : > { %v1209_v1 = vsub.f32 %v3209_v35, %v1173_v8  ;;  %v1203_v21 = vsub.f32 %v3206_v34, %v1155_v39  ;;  %v1194_v35 = vsub.f32 %v3131_v22, %v3255_v24 }
 0x400   : > { %v1226_v44 = vmul.f32 1.442695, %v1187_v57 }
 0x401   : > { %v1270_v50 = vmul.f32 1.442695, %v1209_v1  ;;  %v1258_v3 = vmul.f32 1.442695, %v1203_v21  ;;  %v3317_v14 = vpop.eup %2567  ;;  %v1240_v22 = vmul.f32 1.442695, %v1194_v35  ;;  %v1191_v35 = vsub.f32 %v3125_v16, %v3304_v15 }
 0x402   : > { %v1423_v34 = vpack.c.bf16 %v3317_v14, %v3317_v14  ;;  %v3325_v42 = vpop.eup %2569 }
 0x403   : > { %2575 = vpow2.f32 %v1270_v50  ;;  %v3331_v6 = vpop.eup %2571  ;;  %v1432_v20 = vpack.c.bf16 %v3325_v42, %v3325_v42 }
 0x404   : > { %2577 = vpow2.f32 %v1258_v3  ;;  %v3329_v59 = vunpack.c.l.b16 %v1423_v34  ;;  %v3335_v36 = vpop.eup %2573  ;;  %v1426_v18 = vpack.c.bf16 %v3331_v6, %v3331_v6 }
 0x405   : > { %2579 = vpow2.f32 %v1218_v53  ;;  %1157 = vmax.xlane.f32.xlu2 %v1156_v5  ;;  %v2522_v60 = vpop.trf.xlu2  ;;  %v3357_v51 = vunpack.c.l.b16 %v1432_v20  ;;  %v1294_v62 = vsel %vm1083_vm2, %v3335_v36, 0.0 }
 0x406   : > { %2581 = vpow2.f32 %v1230_v55  ;;  %1451 = vmatpush.bf16.msra.mxu0 %v2522_v60  ;;  %v1638_v24 = vpack.c.b16 %v3329_v59, %v3327_v0  ;;  %v3367_v50 = vunpack.c.l.b16 %v1426_v18  ;;  %v1190_v60 = vsub.f32 %v3113_v9, %v3253_v23 }
 0x407   : > { %2583 = vpow2.f32 %v1216_v48  ;;  %v1234_v18 = vmul.f32 1.442695, %v1191_v35 }
 0x408   : > { %2585 = vpow2.f32 %v1228_v61 }
 0x409   : > { %v3339_v37 = vpop.eup %2575  ;;  %2328 = vmatmul.msk.bf16.vlgmr.msra.gmra.mxu0 %vm1083_vm2, %v3653_v25  ;;  %2587 = vpow2.f32 %v1240_v22  ;;  %v1222_v22 = vmul.f32 1.442695, %v1185_v47 }
 0x40a   : > { %v3347_v8 = vpop.eup %2577  ;;  %v1433_v39 = vpack.c.bf16 %v3339_v37, %v3339_v37 }
 0x40b   : > { %v3351_v27 = vpop.eup %2579  ;;  %v1427_v1 = vpack.c.bf16 %v3347_v8, %v3347_v8  ;;  %2589 = vpow2.f32 %v1222_v22 }
 0x40c   : > { %v3355_v21 = vpop.eup %2581  ;;  %v3359_v53 = vunpack.c.l.b16 %v1433_v39  ;;  %v1407_v61 = vpack.c.bf16 %v3351_v27, %v3351_v27  ;;  %v1232_v39 = vmul.f32 1.442695, %v1190_v60  ;;  %2591 = vpow2.f32 %v1234_v18 }
 0x40d   : > { %v3363_v63 = vpop.eup %2583  ;;  %v3369_v3 = vunpack.c.l.b16 %v1427_v1  ;;  %v2523_v55 = vpop.trf.xlu2  ;;  %1295 = vadd.xlane.f32.xlu2 %v1294_v62  ;;  %v1413_v4 = vpack.c.bf16 %v3355_v21, %v3355_v21  ;;  %2593 = vpow2.f32 %v1220_v58  ;;  %v1193_v18 = vsub.f32 %v3151_v43, %v3263_v31 }
 0x40e   : > { %v3371_v48 = vpop.eup %2585  ;;  %v1748_v34 = vpack.c.b16 %v3359_v53, %v3357_v51  ;;  %1539 = vmatpush.bf16.msrb.mxu0 %v2523_v55  ;;  %v1406_v15 = vpack.c.bf16 %v3363_v63, %v3363_v63  ;;  %v1461_v54 = vunpack.c.l.b16 %v1407_v61  ;;  %2595 = vpow2.f32 %v1232_v39 }
 0x40f   : > { %v1682_v5 = vpack.c.b16 %v3369_v3, %v3367_v50  ;;  %v3387_v16 = vpop.eup %2587  ;;  %v1412_v20 = vpack.c.bf16 %v3371_v48, %v3371_v48  ;;  %v1527_v25 = vunpack.c.l.b16 %v1413_v4  ;;  %v1336_v4 = vsel %vm1083_vm2, %v3284_v19, 0.0 }
 0x410   : > { %v1318_v1 = vsel %vm1083_vm2, %v3387_v16, 0.0  ;;  %v1460_v62 = vunpack.c.l.b16 %v1406_v15  ;;  %v1192_v15 = vsub.f32 %v3149_v41, %v3261_v30  ;;  %v1238_v58 = vmul.f32 1.442695, %v1193_v18 }
 0x411   : > { %v1526_v9 = vunpack.c.l.b16 %v1412_v20  ;;  %v3397_v35 = vpop.eup %2589  ;;  %2597 = vpow2.f32 %v1226_v44  ;;  %v1330_v43 = vsel %vm1083_vm2, %v3306_v2, 0.0  ;;  %v1195_v18 = vsub.f32 %v3142_v32, %v3259_v56 }
 0x412   : > { %v1462_v55 = vpack.c.b16 %v1461_v54, %v1460_v62  ;;  %v3399_v61 = vpop.eup %2591  ;;  %v1409_v54 = vpack.c.bf16 %v3397_v35, %v3397_v35  ;;  %v1236_v30 = vmul.f32 1.442695, %v1192_v15  ;;  %v1360_v15 = vsel %vm1083_vm2, %v3325_v42, 0.0 }
 0x413   : > { %v1528_v47 = vpack.c.b16 %v1527_v25, %v1526_v9  ;;  %v3405_v60 = vpop.eup %2593  ;;  %v1415_v7 = vpack.c.bf16 %v3399_v61, %v3399_v61  ;;  %v1242_v42 = vmul.f32 1.442695, %v1195_v18  ;;  %v1342_v32 = vsel %vm1083_vm2, %v3331_v6, 0.0 }
 0x414   : > { %v3409_v20 = vpop.eup %2595  ;;  %v1408_v19 = vpack.c.bf16 %v3405_v60, %v3405_v60  ;;  %v1483_v25 = vunpack.c.l.b16 %v1409_v54  ;;  %2599 = vpow2.f32 %v1236_v30  ;;  %v1300_v50 = vsel %vm1083_vm2, %v3371_v48, 0.0 }
 0x415   : > { %v2524_v23 = vpop.trf.xlu2  ;;  %1319 = vadd.xlane.f32.xlu2 %v1318_v1  ;;  %v1414_v41 = vpack.c.bf16 %v3409_v20, %v3409_v20  ;;  %v1549_v39 = vunpack.c.l.b16 %v1415_v7  ;;  %2601 = vpow2.f32 %v1238_v58 }
 0x416   : > { %1473 = vmatpush.bf16.msra.mxu1 %v2524_v23  ;;  %v1482_v31 = vunpack.c.l.b16 %v1408_v19  ;;  %v1410_v19 = vpack.c.bf16 %v3335_v36, %v3335_v36 }
 0x417   : > { %v1548_v1 = vunpack.c.l.b16 %v1414_v41 }
 0x418   : > { %v1484_v9 = vpack.c.b16 %v1483_v25, %v1482_v31  ;;  %v1504_v56 = vunpack.c.l.b16 %v1410_v19  ;;  %v1205_v19 = vsub.f32 %v3140_v28, %v3257_v29 }
 0x419   : > { %2329 = vmatmul.msk.bf16.vlgmr.msra.gmra.mxu1 %vm1083_vm2, %v1462_v55  ;;  %2332 = vmatmul.msk.bf16.vlgmr.msrb.gmra.mxu0 %vm1083_vm2, %v1528_v47  ;;  %v1550_v23 = vpack.c.b16 %v1549_v39, %v1548_v1  ;;  %v1164_v55 = vpop.xlane.xlu0 %1163  ;;  %v3425_v47 = vpop.eup %2597 }
 0x41a   : > { %v3427_v57 = vpop.eup %2599  ;;  %v1206_v2 = vsub.f32 %v3216_v40, %v1164_v55  ;;  %v1411_v54 = vpack.c.bf16 %v3425_v47, %v3425_v47  ;;  %v1176_v39 = vpop.xlane.xlu1 %1175  ;;  %v1297_v48 = vsel %vm1083_vm2, %v3425_v47, 0.0 }
 0x41b   : > { %v1416_v7 = vpack.c.bf16 %v3427_v57, %v3427_v57  ;;  %v1210_v1 = vsub.f32 %v3219_v45, %v1176_v39  ;;  %v1418_v45 = vpack.c.bf16 %v3387_v16, %v3387_v16  ;;  %v3654_v16 = vpack.c.b16 %v3279_v13, %v3277_v10 }
 0x41c   : > { %v1264_v44 = vmul.f32 1.442695, %v1206_v2  ;;  %v1505_v41 = vunpack.c.l.b16 %v1411_v54 }
 0x41d   : > { %v2525_v22 = vpop.trf.xlu2  ;;  %1337 = vadd.xlane.f32.xlu2 %v1336_v4  ;;  %v3430_v4 = vpop.eup %2601  ;;  %v1570_v30 = vunpack.c.l.b16 %v1416_v7  ;;  %v1272_v36 = vmul.f32 1.442695, %v1210_v1  ;;  %v1303_v7 = vsel %vm1083_vm2, %v3355_v21, 0.0 }
 0x41e   : > { %1561 = vmatpush.bf16.msrb.mxu1 %v2525_v22  ;;  %v1417_v40 = vpack.c.bf16 %v3430_v4, %v3430_v4  ;;  %2603 = vpow2.f32 %v1264_v44 }
 0x41f   : > { %2605 = vpow2.f32 %v1242_v42 }
 0x420   : > { %v1571_v58 = vunpack.c.l.b16 %v1417_v40  ;;  %2607 = vpow2.f32 %v1272_v36 }
 0x422   : > { %v1572_v31 = vpack.c.b16 %v1571_v58, %v1570_v30  ;;  %v1167_v44 = vpop.xlane.xlu1 %1166  ;;  %v1262_v30 = vmul.f32 1.442695, %v1205_v19 }
 0x424   : > { %2609 = vpow2.f32 %v1262_v30 }
 0x425   : > { %v2526_v62 = vpop.trf.xlu2  ;;  %1331 = vadd.xlane.f32.xlu2 %v1330_v43  ;;  %v1506_v43 = vpack.c.b16 %v1505_v41, %v1504_v56  ;;  %v1207_v41 = vsub.f32 %v3226_v49, %v1167_v44 }
 0x426   : > { %1495 = vmatpush.bf16.msra.mxu2 %v2526_v62  ;;  %v2604_v62 = vpop.eup %2603 }
 0x427   : > { %v1354_v6 = vsel %vm1083_vm2, %v2604_v62, 0.0  ;;  %v1266_v58 = vmul.f32 1.442695, %v1207_v41  ;;  %v1339_v41 = vsel %vm1083_vm2, %v3286_v33, 0.0 }
 0x429   : > { %2330 = vmatmul.msk.bf16.vlgmr.msra.gmra.mxu2 %vm1083_vm2, %v1484_v9  ;;  %2333 = vmatmul.msk.bf16.vlgmr.msrb.gmra.mxu1 %vm1083_vm2, %v1550_v23  ;;  %v3449_v9 = vpop.eup %2605  ;;  %2611 = vpow2.f32 %v1266_v58 }
 0x42a   : > { %v1419_v55 = vpack.c.bf16 %v3449_v9, %v3449_v9 }
 0x42c   : > { %v1593_v2 = vunpack.c.l.b16 %v1419_v55  ;;  %v1179_v55 = vpop.xlane.xlu1 %1178 }
 0x42d   : > { %v2527_v22 = vpop.trf.xlu2  ;;  %1361 = vadd.xlane.f32.xlu2 %v1360_v15  ;;  %v3456_v15 = vpop.eup %2607 }
 0x42e   : > { %1583 = vmatpush.bf16.msrb.mxu2 %v2527_v22  ;;  %v1592_v22 = vunpack.c.l.b16 %v1418_v45  ;;  %v1366_v54 = vsel %vm1083_vm2, %v3456_v15, 0.0  ;;  %v2610_v28 = vpop.eup %2609 }
 0x42f   : > { %v3475_v29 = vpop.eup %2611  ;;  %v1429_v13 = vpack.c.bf16 %v2610_v28, %v2610_v28 }
 0x430   : > { %v1594_v18 = vpack.c.b16 %v1593_v2, %v1592_v22  ;;  %v1211_v2 = vsub.f32 %v3231_v11, %v1179_v55  ;;  %v1351_v22 = vsel %vm1083_vm2, %v2610_v28, 0.0  ;;  %v1285_v11 = vsel %vm1083_vm2, %v3351_v27, 0.0 }
 0x431   : > { %v1703_v1 = vunpack.c.l.b16 %v1429_v13  ;;  %v1288_v27 = vsel %vm1083_vm2, %v3405_v60, 0.0  ;;  %v1321_v60 = vsel %vm1083_vm2, %v3449_v9, 0.0  ;;  %v1327_v9 = vsel %vm1083_vm2, %v3271_v26, 0.0 }
 0x434   : > { %v1278_v47 = vpop.xlane.xlu1 %1277 }
 0x435   : > { %v2528_v25 = vpop.trf.xlu2  ;;  %1343 = vadd.xlane.f32.xlu2 %v1342_v32 }
 0x436   : > { %1517 = vmatpush.bf16.msra.mxu3 %v2528_v25  ;;  %v1431_v25 = vpack.c.bf16 %v3475_v29, %v3475_v29 }
 0x438   : > { %v1725_v0 = vunpack.c.l.b16 %v1431_v25 }
 0x439   : > { %2331 = vmatmul.msk.bf16.vlgmr.msra.gmra.mxu3 %vm1083_vm2, %v1506_v43  ;;  %2334 = vmatmul.msk.bf16.vlgmr.msrb.gmra.mxu2 %vm1083_vm2, %v1572_v31  ;;  %v1430_v43 = vpack.c.bf16 %v2604_v62, %v2604_v62  ;;  %v1282_v62 = vsel %vm1083_vm2, %v3363_v63, 0.0 }
 0x43c   : > { %v1281_v19 = vpop.xlane.xlu1 %1280 }
 0x43d   : > { %1355 = vadd.xlane.f32.xlu2 %v1354_v6  ;;  %v2529_v23 = vpop.trf.xlu2 }
 0x43e   : > { %1605 = vmatpush.bf16.msrb.mxu3 %v2529_v23 }
 0x445   : > { %1367 = vadd.xlane.f32.xlu2 %v1366_v54 }
 0x449   : > { %2335 = vmatmul.msk.bf16.vlgmr.msrb.gmra.mxu3 %vm1083_vm2, %v1594_v18  ;;  %v1274_v18 = vmul.f32 1.442695, %v1211_v2 }
 0x45d   : > { %1304 = vadd.xlane.f32.xlu0 %v1303_v7 }
 0x468   : > { %v2531_v40 = vpop.trf.xlu0 }
 0x469   : > { %1627 = vmatpush.bf16.msra.mxu0 %v2531_v40 }
 0x46c   : > { %2336 = vmatmul.msk.bf16.vlgmr.msra.gmra.mxu0 %vm1083_vm2, %v3654_v16  ;;  %v1324_v16 = vsel %vm1083_vm2, %v3269_v52, 0.0 }
 0x470   : > { %v2532_v42 = vpop.trf.xlu0 }
 0x471   : > { %1715 = vmatpush.bf16.msrb.mxu0 %v2532_v42 }
 0x478   : > { %v1158_v21 = vpop.xlane.xlu2 %1157  ;;  %v2533_v32 = vpop.trf.xlu0 }
 0x479   : > { %v1204_v56 = vsub.f32 %v3119_v12, %v1158_v21  ;;  %1649 = vmatpush.bf16.msra.mxu1 %v2533_v32 }
 0x47b   : > { %v1260_v10 = vmul.f32 1.442695, %v1204_v56  ;;  %v1363_v56 = vsel %vm1083_vm2, %v3339_v37, 0.0 }
 0x47c   : > { %2337 = vmatmul.msk.bf16.vlgmr.msra.gmra.mxu1 %vm1083_vm2, %v1638_v24  ;;  %v1724_v24 = vunpack.c.l.b16 %v1430_v43 }
 0x47d   : > { %2613 = vpow2.f32 %v1260_v10 }
 0x47e   : > { %v1726_v23 = vpack.c.b16 %v1725_v0, %v1724_v24  ;;  %2615 = vpow2.f32 %v1274_v18 }
 0x480   : > { %v2534_v49 = vpop.trf.xlu0 }
 0x481   : > { %1737 = vmatpush.bf16.msrb.mxu1 %v2534_v49 }
 0x483   : > { %v2614_v39 = vpop.eup %2613 }
 0x484   : > { %v1428_v12 = vpack.c.bf16 %v2614_v39, %v2614_v39  ;;  %v1348_v31 = vsel %vm1083_vm2, %v2614_v39, 0.0  ;;  %v3500_v38 = vpop.eup %2615 }
 0x485   : > { %1349 = vadd.xlane.f32.xlu1 %v1348_v31  ;;  %v1435_v63 = vpack.c.bf16 %v3500_v38, %v3500_v38 }
 0x486   : > { %v1702_v59 = vunpack.c.l.b16 %v1428_v12  ;;  %v1453_v7 = vpop.f32.mrf.mxu0  ;;  %v1357_v12 = vsel %vm1083_vm2, %v3475_v29, 0.0 }
 0x487   : > { %v1769_v53 = vunpack.c.l.b16 %v1435_v63  ;;  %v1369_v63 = vsel %vm1083_vm2, %v3500_v38, 0.0 }
 0x488   : > { %v1704_v36 = vpack.c.b16 %v1703_v1, %v1702_v59  ;;  %v2535_v6 = vpop.trf.xlu0 }
 0x489   : > { %1671 = vmatpush.bf16.msra.mxu2 %v2535_v6 }
 0x48a   : > { %2340 = vmatmul.msk.bf16.vlgmr.msrb.gmra.mxu0 %vm1083_vm2, %v1704_v36 }
 0x48c   : > { %2338 = vmatmul.msk.bf16.vlgmr.msra.gmra.mxu2 %vm1083_vm2, %v1660_v17  ;;  %2341 = vmatmul.msk.bf16.vlgmr.msrb.gmra.mxu1 %vm1083_vm2, %v1726_v23  ;;  %v1434_v17 = vpack.c.bf16 %v3456_v15, %v3456_v15  ;;  %v1309_v15 = vsel %vm1083_vm2, %v3399_v61, 0.0  ;;  %v1315_v61 = vsel %vm1083_vm2, %v3430_v4, 0.0  ;;  %v1333_v4 = vsel %vm1083_vm2, %v3317_v14, 0.0 }
 0x48d   : > { %1283 = vadd.xlane.f32.xlu1 %v1282_v62  ;;  %v1345_v23 = vsel %vm1083_vm2, %v3347_v8, 0.0 }
 0x48e   : > { %v1768_v51 = vunpack.c.l.b16 %v1434_v17  ;;  %v1455_v40 = vpop.f32.mrf.mxu0 }
 0x490   : > { %v2536_v45 = vpop.trf.xlu0  ;;  %v1770_v3 = vpack.c.b16 %v1769_v53, %v1768_v51 }
 0x491   : > { %1759 = vmatpush.bf16.msrb.mxu2 %v2536_v45 }
 0x495   : > { %1352 = vadd.xlane.f32.xlu1 %v1351_v22 }
 0x496   : > { %v1475_v8 = vpop.f32.mrf.mxu1 }
 0x498   : > { %v2537_v54 = vpop.trf.xlu0 }
 0x499   : > { %1693 = vmatpush.bf16.msra.mxu3 %v2537_v54 }
 0x49c   : > { %2339 = vmatmul.msk.bf16.vlgmr.msra.gmra.mxu3 %vm1083_vm2, %v1682_v5  ;;  %2342 = vmatmul.msk.bf16.vlgmr.msrb.gmra.mxu2 %vm1083_vm2, %v1748_v34  ;;  %v1291_v34 = vsel %vm1083_vm2, %v3397_v35, 0.0  ;;  %v1306_v5 = vsel %vm1083_vm2, %v3409_v20, 0.0  ;;  %v1312_v35 = vsel %vm1083_vm2, %v3427_v57, 0.0  ;;  %v1541_v20 = vpop.f32.mrf.mxu0 }
 0x49d   : > { %1286 = vadd.xlane.f32.xlu1 %v1285_v11 }
 0x4a0   : > { %v2538_v46 = vpop.trf.xlu0 }
 0x4a1   : > { %1781 = vmatpush.bf16.msrb.mxu3 %v2538_v46 }
 0x4a4   : > { %v1543_v44 = vpop.f32.mrf.mxu0 }
 0x4a5   : > { %1301 = vadd.xlane.f32.xlu1 %v1300_v50 }
 0x4ac   : > { %2343 = vmatmul.msk.bf16.vlgmr.msrb.gmra.mxu3 %vm1083_vm2, %v1770_v3 }
 0x4ad   : > { %1289 = vadd.xlane.f32.xlu1 %v1288_v27  ;;  %v1477_v27 = vpop.f32.mrf.mxu1 }
 0x4b5   : > { %1292 = vadd.xlane.f32.xlu1 %v1291_v34 }
 0x4bd   : > { %1307 = vadd.xlane.f32.xlu1 %v1306_v5  ;;  %v1563_v5 = vpop.f32.mrf.mxu1 }
 0x4c5   : > { %1298 = vadd.xlane.f32.xlu1 %v1297_v48 }
 0x4cd   : > { %1310 = vadd.xlane.f32.xlu1 %v1309_v15 }
 0x4d0   : > { %v1305_v28 = vpop.xlane.xlu0 %1304 }
 0x4d5   : > { %1322 = vadd.xlane.f32.xlu1 %v1321_v60 }
 0x4dd   : > { %1313 = vadd.xlane.f32.xlu1 %v1312_v35 }
 0x4e5   : > { %1325 = vadd.xlane.f32.xlu1 %v1324_v16 }
 0x4e9   : > { %v3529_v42 = vpop.f32.mrf.mxu0 }
 0x4ed   : > { %1316 = vadd.xlane.f32.xlu1 %v1315_v61  ;;  %v1565_v61 = vpop.f32.mrf.mxu1 }
 0x4f1   : > { %v3533_v52 = vpop.f32.mrf.mxu0 }
 0x4f5   : > { %1328 = vadd.xlane.f32.xlu1 %v1327_v9 }
 0x4f8   : > { %v1350_v57 = vpop.xlane.xlu1 %1349 }
 0x4f9   : > { %2617 = vrcp.f32 %v1350_v57 }
 0x4fd   : > { %1340 = vadd.xlane.f32.xlu1 %v1339_v41  ;;  %v1497_v41 = vpop.f32.mrf.mxu2 }
 0x4ff   : > { %v2618_v26 = vpop.eup %2617 }
 0x500   : > { %v1284_v30 = vpop.xlane.xlu1 %1283 }
 0x505   : > { %1334 = vadd.xlane.f32.xlu1 %v1333_v4 }
 0x507   : > { %v1717_v58 = vpop.f32.mrf.mxu0 }
 0x508   : > { %v1353_v21 = vpop.xlane.xlu1 %1352  ;;  %v1812_v32 = vmul.f32 %v2618_v26, %v1717_v58 }
 0x509   : > { %2619 = vrcp.f32 %v1353_v21 }
 0x50a   : > { %v1844_v49 = vpack.c.bf16 %v1812_v32, %v1812_v32  ;;  %2621 = vrcp.f32 %v1281_v19 }
 0x50b   : > { %2623 = vrcp.f32 %v1305_v28  ;;  %v1499_v28 = vpop.f32.mrf.mxu2 }
 0x50c   : > { %v3539_v14 = vunpack.c.l.b16 %v1844_v49  ;;  %2625 = vrcp.f32 %v1278_v47  ;;  %v1519_v49 = vpop.f32.mrf.mxu3 }
 0x50d   : > { %1364 = vadd.xlane.f32.xlu1 %v1363_v56 }
 0x50f   : > { %v2620_v10 = vpop.eup %2619  ;;  %v1719_v33 = vpop.f32.mrf.mxu0 }
 0x510   : > { %v1813_v13 = vmul.f32 %v2620_v10, %v1719_v33  ;;  %v1287_v25 = vpop.xlane.xlu1 %1286  ;;  %v2622_v31 = vpop.eup %2621 }
 0x511   : > { %v2624_v0 = vpop.eup %2623  ;;  %v1789_v59 = vmul.f32 %v2622_v31, %v1455_v40 }
 0x512   : > { %v1845_v39 = vpack.c.bf16 %v1813_v13, %v1813_v13  ;;  %v2626_v24 = vpop.eup %2625  ;;  %v1797_v6 = vmul.f32 %v2624_v0, %v1543_v44 }
 0x513   : > { %v1788_v36 = vmul.f32 %v2626_v24, %v1453_v7  ;;  %v1821_v62 = vpack.c.bf16 %v1789_v59, %v1789_v59 }
 0x514   : > { %v3541_v43 = vunpack.c.l.b16 %v1845_v39  ;;  %v1829_v45 = vpack.c.bf16 %v1797_v6, %v1797_v6  ;;  %v1585_v39 = vpop.f32.mrf.mxu2 }
 0x515   : > { %1358 = vadd.xlane.f32.xlu1 %v1357_v12  ;;  %v1820_v29 = vpack.c.bf16 %v1788_v36, %v1788_v36  ;;  %v1885_v18 = vunpack.c.l.b16 %v1821_v62  ;;  %v1521_v12 = vpop.f32.mrf.mxu3 }
 0x516   : > { %v1928_v37 = vpack.c.b16 %v3541_v43, %v3539_v14  ;;  %v1893_v46 = vunpack.c.l.b16 %v1829_v45 }
 0x517   : > { %v1884_v11 = vunpack.c.l.b16 %v1820_v29 }
 0x518   : > { %v1302_v1 = vpop.xlane.xlu1 %1301 }
 0x519   : > { %2627 = vrcp.f32 %v1302_v1  ;;  %v1916_v50 = vpack.c.b16 %v1885_v18, %v1884_v11 }
 0x51a   : > { %2629 = vrcp.f32 %v1287_v25 }
 0x51b   : > { %2631 = vrcp.f32 %v1284_v30 }
 0x51c   : > { %v1587_v29 = vpop.f32.mrf.mxu2 }
 0x51d   : > { %1346 = vadd.xlane.f32.xlu1 %v1345_v23  ;;  %v1607_v45 = vpop.f32.mrf.mxu3 }
 0x51f   : > { %v2628_v55 = vpop.eup %2627 }
 0x520   : > { %v1796_v2 = vmul.f32 %v2628_v55, %v1541_v20  ;;  %v1290_v22 = vpop.xlane.xlu1 %1289  ;;  %v2630_v48 = vpop.eup %2629 }
 0x521   : > { %v2632_v15 = vpop.eup %2631  ;;  %v1791_v40 = vmul.f32 %v2630_v48, %v1477_v27  ;;  %v1296_v20 = vpop.xlane.xlu2 %1295 }
 0x522   : > { %v1828_v54 = vpack.c.bf16 %v1796_v2, %v1796_v2  ;;  %v1790_v38 = vmul.f32 %v2632_v15, %v1475_v8 }
 0x523   : > { %v1823_v16 = vpack.c.bf16 %v1791_v40, %v1791_v40 }
 0x524   : > { %v1892_v17 = vunpack.c.l.b16 %v1828_v54  ;;  %v1822_v44 = vpack.c.bf16 %v1790_v38, %v1790_v38 }
 0x525   : > { %1370 = vadd.xlane.f32.xlu1 %v1369_v63  ;;  %v1887_v30 = vunpack.c.l.b16 %v1823_v16  ;;  %v1609_v38 = vpop.f32.mrf.mxu3 }
 0x526   : > { %v1920_v51 = vpack.c.b16 %v1893_v46, %v1892_v17  ;;  %v1886_v58 = vunpack.c.l.b16 %v1822_v44 }
 0x528   : > { %v1293_v53 = vpop.xlane.xlu1 %1292  ;;  %2539 = vxpose.binary.xlu0.c.b16.start [1/8] (short) (narrow) %v1920_v51, %v1916_v50, 16  ;;  %v1917_v32 = vpack.c.b16 %v1887_v30, %v1886_v58 }
 0x529   : > { %v1320_v10 = vpop.xlane.xlu2 %1319 }
 0x530   : > { %v1308_v3 = vpop.xlane.xlu1 %1307 }
 0x531   : > { %2633 = vrcp.f32 %v1308_v3  ;;  %v3551_v25 = vpop.xlane.xlu2 %1337 }
 0x537   : > { %v2634_v60 = vpop.eup %2633 }
 0x538   : > { %v1299_v34 = vpop.xlane.xlu1 %1298  ;;  %v1798_v35 = vmul.f32 %v2634_v60, %v1563_v5 }
 0x539   : > { %v3553_v36 = vpop.xlane.xlu2 %1331 }
 0x53a   : > { %v1830_v19 = vpack.c.bf16 %v1798_v35, %v1798_v35  ;;  %v1651_v35 = vpop.f32.mrf.mxu1 }
 0x53c   : > { %v1894_v21 = vunpack.c.l.b16 %v1830_v19 }
 0x540   : > { %v1311_v7 = vpop.xlane.xlu1 %1310 }
 0x541   : > { %2635 = vrcp.f32 %v1311_v7  ;;  %v3556_v27 = vpop.xlane.xlu2 %1361 }
 0x542   : > { %2637 = vrcp.f32 %v1293_v53 }
 0x543   : > { %2639 = vrcp.f32 %v1290_v22 }
 0x547   : > { %v2636_v47 = vpop.eup %2635 }
 0x548   : > { %v1799_v9 = vmul.f32 %v2636_v47, %v1565_v61  ;;  %v1323_v57 = vpop.xlane.xlu1 %1322  ;;  %v2638_v31 = vpop.eup %2637 }
 0x549   : > { %v2640_v1 = vpop.eup %2639  ;;  %v1793_v24 = vmul.f32 %v2638_v31, %v1499_v28 }
 0x54a   : > { %v1831_v4 = vpack.c.bf16 %v1799_v9, %v1799_v9  ;;  %v1792_v6 = vmul.f32 %v2640_v1, %v1497_v41 }
 0x54b   : > { %v1825_v62 = vpack.c.bf16 %v1793_v24, %v1793_v24  ;;  %v1695_v24 = vpop.f32.mrf.mxu3 }
 0x54c   : > { %v1895_v26 = vunpack.c.l.b16 %v1831_v4  ;;  %v1824_v2 = vpack.c.bf16 %v1792_v6, %v1792_v6  ;;  %v3559_v4 = vpop.xlane.xlu2 %1343 }
 0x54d   : > { %v1889_v46 = vunpack.c.l.b16 %v1825_v62 }
 0x54e   : > { %v1921_v56 = vpack.c.b16 %v1895_v26, %v1894_v21  ;;  %v1888_v63 = vunpack.c.l.b16 %v1824_v2 }
 0x550   : > { %v1314_v33 = vpop.xlane.xlu1 %1313  ;;  %2540 = vxpose.binary.xlu0.c.b16.cont [2/8] (short) (narrow) %v1921_v56, %v1917_v32, 16  ;;  %v1653_v56 = vpop.f32.mrf.mxu1 }
 0x551   : > { %2641 = vrcp.f32 %v1314_v33 }
 0x557   : > { %v2642_v59 = vpop.eup %2641 }
 0x558   : > { %v1326_v13 = vpop.xlane.xlu1 %1325  ;;  %v1800_v23 = vmul.f32 %v2642_v59, %v1585_v39  ;;  %v1739_v31 = vpop.f32.mrf.mxu1 }
 0x55a   : > { %v1832_v22 = vpack.c.bf16 %v1800_v23, %v1800_v23 }
 0x55c   : > { %v1896_v50 = vunpack.c.l.b16 %v1832_v22 }
 0x560   : > { %v1317_v0 = vpop.xlane.xlu1 %1316 }
 0x561   : > { %2643 = vrcp.f32 %v1317_v0 }
 0x562   : > { %2645 = vrcp.f32 %v1326_v13 }
 0x563   : > { %2647 = vrcp.f32 %v1299_v34  ;;  %v1918_v34 = vpack.c.b16 %v1889_v46, %v1888_v63 }
 0x564   : > { %2649 = vrcp.f32 %v1323_v57 }
 0x567   : > { %v2644_v55 = vpop.eup %2643 }
 0x568   : > { %v1801_v18 = vmul.f32 %v2644_v55, %v1587_v29  ;;  %v1329_v54 = vpop.xlane.xlu1 %1328  ;;  %v2646_v11 = vpop.eup %2645 }
 0x569   : > { %2651 = vrcp.f32 %v1329_v54  ;;  %v1804_v51 = vmul.f32 %v2646_v11, %v3529_v42  ;;  %v2648_v8 = vpop.eup %2647  ;;  %v1741_v29 = vpop.f32.mrf.mxu1 }
 0x56a   : > { %v1833_v17 = vpack.c.bf16 %v1801_v18, %v1801_v18  ;;  %2653 = vrcp.f32 %v1296_v20  ;;  %v2650_v3 = vpop.eup %2649  ;;  %v1795_v20 = vmul.f32 %v2648_v8, %v1521_v12  ;;  %v1356_v12 = vpop.xlane.xlu2 %1355 }
 0x56b   : > { %2655 = vrcp.f32 %v1320_v10  ;;  %v1836_v15 = vpack.c.bf16 %v1804_v51, %v1804_v51  ;;  %v1803_v16 = vmul.f32 %v2650_v3, %v1609_v38  ;;  %v1673_v10 = vpop.f32.mrf.mxu2 }
 0x56c   : > { %v1897_v53 = vunpack.c.l.b16 %v1833_v17  ;;  %v1827_v57 = vpack.c.bf16 %v1795_v20, %v1795_v20 }
 0x56d   : > { %v1900_v19 = vunpack.c.l.b16 %v1836_v15  ;;  %v1835_v41 = vpack.c.bf16 %v1803_v16, %v1803_v16 }
 0x56e   : > { %v1922_v5 = vpack.c.b16 %v1897_v53, %v1896_v50  ;;  %v1891_v26 = vunpack.c.l.b16 %v1827_v57  ;;  %v1697_v50 = vpop.f32.mrf.mxu3 }
 0x56f   : > { %v2652_v48 = vpop.eup %2651  ;;  %v1899_v32 = vunpack.c.l.b16 %v1835_v41 }
 0x570   : > { %v1805_v7 = vmul.f32 %v2652_v48, %v3533_v52  ;;  %v1341_v60 = vpop.xlane.xlu1 %1340  ;;  %2541 = vxpose.binary.xlu0.c.b16.cont [3/8] (short) (narrow) %v1922_v5, %v1918_v34, 16  ;;  %v2654_v40 = vpop.eup %2653 }
 0x571   : > { %v2656_v47 = vpop.eup %2655  ;;  %v1794_v61 = vmul.f32 %v2654_v40, %v1519_v49 }
 0x572   : > { %v1837_v42 = vpack.c.bf16 %v1805_v7, %v1805_v7  ;;  %v1802_v44 = vmul.f32 %v2656_v47, %v1607_v45 }
 0x573   : > { %v1826_v58 = vpack.c.bf16 %v1794_v61, %v1794_v61  ;;  %v1675_v1 = vpop.f32.mrf.mxu2 }
 0x574   : > { %v1901_v9 = vunpack.c.l.b16 %v1837_v42  ;;  %v1834_v52 = vpack.c.bf16 %v1802_v44, %v1802_v44 }
 0x575   : > { %v1890_v33 = vunpack.c.l.b16 %v1826_v58 }
 0x576   : > { %v1924_v30 = vpack.c.b16 %v1901_v9, %v1900_v19  ;;  %v1898_v28 = vunpack.c.l.b16 %v1834_v52  ;;  %v1783_v20 = vpop.f32.mrf.mxu3 }
 0x577   : > { %v1919_v49 = vpack.c.b16 %v1891_v26, %v1890_v33 }
 0x578   : > { %v1335_v21 = vpop.xlane.xlu1 %1334  ;;  %2545 = vxpose.binary.xlu2.c.b16.start [1/8] (short) (narrow) %v1928_v37, %v1924_v30, 16  ;;  %v1923_v13 = vpack.c.b16 %v1899_v32, %v1898_v28 }
 0x579   : > { %2657 = vrcp.f32 %v1335_v21 }
 0x57a   : > { %2659 = vrcp.f32 %v3553_v36 }
 0x57b   : > { %2661 = vrcp.f32 %v1356_v12  ;;  %v1761_v45 = vpop.f32.mrf.mxu2 }
 0x57e   : > { %v1785_v58 = vpop.f32.mrf.mxu3 }
 0x57f   : > { %v2658_v0 = vpop.eup %2657 }
 0x580   : > { %v1365_v39 = vpop.xlane.xlu1 %1364  ;;  %2542 = vxpose.binary.xlu0.c.b16.end [4/8] (short) (narrow) %v1923_v13, %v1919_v49, 16  ;;  %v2660_v43 = vpop.eup %2659  ;;  %v1807_v37 = vmul.f32 %v2658_v0, %v1653_v56 }
 0x581   : > { %v2662_v59 = vpop.eup %2661  ;;  %v1806_v6 = vmul.f32 %v2660_v43, %v1651_v35 }
 0x582   : > { %v1814_v23 = vmul.f32 %v2662_v59, %v1739_v31  ;;  %v1839_v62 = vpack.c.bf16 %v1807_v37, %v1807_v37 }
 0x583   : > { %v1838_v2 = vpack.c.bf16 %v1806_v6, %v1806_v6  ;;  %v1763_v34 = vpop.f32.mrf.mxu2 }
 0x584   : > { %v1846_v22 = vpack.c.bf16 %v1814_v23, %v1814_v23  ;;  %v1903_v18 = vunpack.c.l.b16 %v1839_v62  ;;  %v2366_v23 = vld [vmem:[#allocation7 + $0x8] sm:$0xff] }
 0x585   : > { %v1902_v11 = vunpack.c.l.b16 %v1838_v2  ;;  %2078 = vmatpush.bf16.msra.mxu0 %v2366_v23 }
 0x586   : > { %v1910_v46 = vunpack.c.l.b16 %v1846_v22 }
 0x587   : > { %v1925_v53 = vpack.c.b16 %v1903_v18, %v1902_v11  ;;  %v2552_v11 = vld [vmem:[%s3630_s4] ss:$0 sm:$0xff] }
 0x588   : > { %v1359_v14 = vpop.xlane.xlu1 %1358 }
 0x589   : > { %2663 = vrcp.f32 %v1359_v14 }
 0x58a   : > { %2665 = vrcp.f32 %v1341_v60 }
 0x58b   : > { %2667 = vrcp.f32 %v1365_v39 }
 0x58c   : > { %2669 = vrcp.f32 %v3551_v25 }
 0x58d   : > { %2671 = vrcp.f32 %v3556_v27  ;;  %v1368_v27 = vpop.xlane.xlu2 %1367 }
 0x58f   : > { %v2664_v55 = vpop.eup %2663 }
 0x590   : > { %v1815_v36 = vmul.f32 %v2664_v55, %v1741_v29  ;;  %v1347_v63 = vpop.xlane.xlu1 %1346  ;;  %v2666_v51 = vpop.eup %2665 }
 0x591   : > { %v2668_v3 = vpop.eup %2667  ;;  %v1809_v48 = vmul.f32 %v2666_v51, %v1675_v1  ;;  %2673 = vrcp.f32 %v1347_v63 }
 0x592   : > { %v1847_v54 = vpack.c.bf16 %v1815_v36, %v1815_v36  ;;  %v2670_v5 = vpop.eup %2669  ;;  %v1817_v15 = vmul.f32 %v2668_v3, %v1763_v34 }
 0x593   : > { %v2672_v7 = vpop.eup %2671  ;;  %v1808_v60 = vmul.f32 %v2670_v5, %v1673_v10  ;;  %v1841_v25 = vpack.c.bf16 %v1809_v48, %v1809_v48 }
 0x594   : > { %v1911_v17 = vunpack.c.l.b16 %v1847_v54  ;;  %v1816_v40 = vmul.f32 %v2672_v7, %v1761_v45  ;;  %v1849_v38 = vpack.c.bf16 %v1817_v15, %v1817_v15 }
 0x595   : > { %v1840_v16 = vpack.c.bf16 %v1808_v60, %v1808_v60  ;;  %v1905_v47 = vunpack.c.l.b16 %v1841_v25 }
 0x596   : > { %v1929_v8 = vpack.c.b16 %v1911_v17, %v1910_v46  ;;  %v1848_v42 = vpack.c.bf16 %v1816_v40, %v1816_v40  ;;  %v1913_v61 = vunpack.c.l.b16 %v1849_v38 }
 0x597   : > { %v1904_v44 = vunpack.c.l.b16 %v1840_v16  ;;  %v2674_v9 = vpop.eup %2673 }
 0x598   : > { %2546 = vxpose.binary.xlu2.c.b16.cont [2/8] (short) (narrow) %v1929_v8, %v1925_v53, 16  ;;  %v1371_v35 = vpop.xlane.xlu1 %1370  ;;  %v1912_v19 = vunpack.c.l.b16 %v1848_v42  ;;  %v1811_v21 = vmul.f32 %v2674_v9, %v1697_v50 }
 0x599   : > { %2675 = vrcp.f32 %v1371_v35  ;;  %v1926_v57 = vpack.c.b16 %v1905_v47, %v1904_v44 }
 0x59a   : > { %2677 = vrcp.f32 %v3559_v4  ;;  %v1930_v41 = vpack.c.b16 %v1913_v61, %v1912_v19  ;;  %v1843_v33 = vpack.c.bf16 %v1811_v21, %v1811_v21 }
 0x59b   : > { %2679 = vrcp.f32 %v1368_v27 }
 0x59c   : > { %v1907_v4 = vunpack.c.l.b16 %v1843_v33 }
 0x59f   : > { %v2676_v30 = vpop.eup %2675 }
 0x5a0   : > { %v2678_v52 = vpop.eup %2677  ;;  %v1819_v26 = vmul.f32 %v2676_v30, %v1785_v58 }
 0x5a1   : > { %v2680_v32 = vpop.eup %2679  ;;  %v1810_v56 = vmul.f32 %v2678_v52, %v1695_v24  ;;  %v2365_v24 = vld [vmem:[#allocation7] sm:$0xff] }
 0x5a2   : > { %v1818_v10 = vmul.f32 %v2680_v32, %v1783_v20  ;;  %v1851_v28 = vpack.c.bf16 %v1819_v26, %v1819_v26  ;;  %2079 = vmatpush.bf16.msra.mxu0 %v2365_v24 }
 0x5a3   : > { %v1842_v49 = vpack.c.bf16 %v1810_v56, %v1810_v56 }
 0x5a4   : > { %v1850_v13 = vpack.c.bf16 %v1818_v10, %v1818_v10  ;;  %v1915_v39 = vunpack.c.l.b16 %v1851_v28 }
 0x5a5   : > { %v1906_v12 = vunpack.c.l.b16 %v1842_v49 }
 0x5a6   : > { %v1914_v31 = vunpack.c.l.b16 %v1850_v13 }
 0x5a7   : > { %v1927_v1 = vpack.c.b16 %v1907_v4, %v1906_v12 }
 0x5a8   : > { %2547 = vxpose.binary.xlu2.c.b16.cont [3/8] (short) (narrow) %v1930_v41, %v1926_v57, 16  ;;  %v1931_v0 = vpack.c.b16 %v1915_v39, %v1914_v31 }
 0x5b8   : > { %2548 = vxpose.binary.xlu2.c.b16.end [4/8] (short) (narrow) %v1931_v0, %v1927_v1, 16 }
 0x5fc   : > { %v2543_v14 = vpop.trf.xlu0 }
 0x5fd   : > { %v2016_v43 = vunpack.c.l.b16 %v2543_v14 }
 0x604   : > { %v2544_v37 = vpop.trf.xlu0 }
 0x605   : > { %v2017_v59 = vunpack.c.l.b16 %v2544_v37 }
 0x607   : > { %v2020_v6 = vpack.c.b16 %v2017_v59, %v2016_v43 }
 0x609   : > { %2024 = vxpose.xlu1.c.b16.start [1/2] (short) (narrow) %v2020_v6, 64 }
 0x629   : > { %v2549_v62 = vpop.trf.xlu2 }
 0x62a   : > { %v2018_v29 = vunpack.c.l.b16 %v2549_v62 }
 0x631   : > { %v2550_v55 = vpop.trf.xlu2 }
 0x632   : > { %v2019_v45 = vunpack.c.l.b16 %v2550_v55 }
 0x634   : > { %v2021_v2 = vpack.c.b16 %v2019_v45, %v2018_v29 }
 0x636   : > { %2025 = vxpose.xlu1.c.b16.end [2/2] (short) (narrow) %v2021_v2, 64 }
 0x6d2   : > { %v2032_v22 = vpop.trf.xlu1 }
 0x6d3   : > { %2352 = vmatmul.msk.bf16.vlgmr.msra.gmra.mxu0 %vm426_vm0, %v2032_v22 }
 0x6e2   : > { %v2033_v36 = vpop.trf.xlu1 }
 0x6e3   : > { %2353 = vmatmul.msk.bf16.gmra.mxu0 %vm426_vm0, %v2033_v36 }
 0x6f2   : > { %v2034_v18 = vpop.trf.xlu1 }
 0x6f3   : > { %2354 = vmatmul.msk.bf16.gmra.mxu0 %vm426_vm0, %v2034_v18 }
 0x702   : > { %v2035_v54 = vpop.trf.xlu1 }
 0x703   : > { %2355 = vmatmul.msk.bf16.gmra.mxu0 %vm426_vm0, %v2035_v54 }
 0x750   : > { %v2081_v46 = vpop.f32.mrf.mxu0 }
 0x751   : > { %v2082_v17 = vadd.f32 %v2552_v11, %v2081_v46 }
 0x753   : > { %2101 = vst.msk [vmem:[%s390_s9] sm:$0xff] %vm426_vm0, %v2082_v17 }
 0x758   : > { %v2083_v63 = vpop.f32.mrf.mxu0 }
 0x759   : > { %v2084_v50 = vadd.f32 %v2552_v11, %v2083_v63 }
 0x75b   : > { %2102 = vst.msk [vmem:[%s390_s9 + $0x8] sm:$0xff] %vm426_vm0, %v2084_v50 }
 0x760   : > { %v2086_v51 = vpop.f32.mrf.mxu0 }
 0x761   : > { %v2087_v53 = vadd.f32 %v2552_v11, %v2086_v51 }
 0x763   : > { %2103 = vst.msk [vmem:[%s390_s9 + $0x10] sm:$0xff] %vm426_vm0, %v2087_v53 }
 0x768   : > { %v2088_v8 = vpop.f32.mrf.mxu0 }
 0x769   : > { %v2089_v3 = vadd.f32 %v2552_v11, %v2088_v8 }
 0x76b   : > { %2104 = vst.msk [vmem:[%s390_s9 + $0x18] sm:$0xff] %vm426_vm0, %v2089_v3 }
 0x770   : > { %v2091_v34 = vpop.f32.mrf.mxu0 }
 0x771   : > { %v2092_v5 = vadd.f32 %v2552_v11, %v2091_v34 }
 0x773   : > { %2105 = vst.msk [vmem:[%s390_s9 + $0x20] sm:$0xff] %vm426_vm0, %v2092_v5 }
 0x778   : > { %v2093_v48 = vpop.f32.mrf.mxu0 }
 0x779   : > { %v2094_v15 = vadd.f32 %v2552_v11, %v2093_v48 }
 0x77b   : > { %2106 = vst.msk [vmem:[%s390_s9 + $0x28] sm:$0xff] %vm426_vm0, %v2094_v15 }
 0x780   : > { %v2096_v7 = vpop.f32.mrf.mxu0 }
 0x781   : > { %v2097_v60 = vadd.f32 %v2552_v11, %v2096_v7 }
 0x783   : > { %2107 = vst.msk [vmem:[%s390_s9 + $0x30] sm:$0xff] %vm426_vm0, %v2097_v60 }
 0x788   : > { %v2098_v40 = vpop.f32.mrf.mxu0 }
 0x789   : > { %v2099_v25 = vadd.f32 %v2552_v11, %v2098_v40 }
 0x78b   : > { %2108 = vst.msk [vmem:[%s390_s9 + $0x38] sm:$0xff] %vm426_vm0, %v2099_v25 }
 0x78c   : > { %s2367_s19 = sshll.u32 %s2823_s24, 4  ;;  %s2135_s14 = sshll.u32 %s390_s9, 4  ;;  %s2136_s14 = int_to_ptr.vmem [resolvable:$true] %s2135_s14 }
 0x78d   : > { %s2124_s30 = scalar_lea.hbm %s3632_s6, %s2367_s19  ;;  %s2845_s20 = smov 256  }
 0x78e   : > { %s2137_s1 = sshll.u32 %s2124_s30, 4  ;;  %2393 = sst [smem:[#allocation14]] (%p2944_p9), %s2845_s20  ;;  %s2138_s1 = int_to_ptr.hbm [resolvable:$true] %s2137_s1 }
 0x78f   : > { %s2846_s16 = smov 512   ;;  %s2847_s28 = smov 2  }
 0x790   : > { %2394 = sst [smem:[#allocation14 + $0x1]] (%p2944_p9), %s2846_s16  ;;  %s2848_s24 = smov 128  }
 0x791   : > { %2395 = sst [smem:[#allocation14 + $0x2]] (%p2944_p9), %s2847_s28  ;;  %s2849_s0 = smov 8  }
 0x792   : > { %2396 = sst [smem:[#allocation14 + $0x3]] (%p2944_p9), %s2848_s24  ;;  %s2850_s23 = smov [#allocation13]  }
 0x793   : > { %2397 = sst [smem:[#allocation14 + $0x4]] (%p2944_p9), %s2848_s24  ;;  %s2851_s12 = smov 0  }
 0x794   : > { %2398 = sst [smem:[#allocation14 + $0x5]] (%p2944_p9), %s2849_s0 }
 0x795   : > { %2399 = dma.general (%p2944_p9), %s2136_s14, 1024, %s2138_s1, %s2110_s15, %s2850_s23, [#allocation14], %s2851_s12, 0  }
 0x796 PF: > { %s3655_s27 = sld [smem:[#allocation21_spill]]  ;;  %s2165_s26 = sand.u32 1, %s2811_s21  }
 0x797   : > { %p2409_p4 = pnand %p2285_p3, %p2951_p11  ;;  %s2166_s7 = scalar_lea.sflag [#allocation4], %s2165_s26 }
 0x799   : > { %p2410_p5 = pneg %p2409_p4 }
 0x79b   : > { %2806 = dma.done.wait (%p2410_p5), %s2166_s7, 1024  }
 0x79c   : > { %2808 = vsyncadd (%p2410_p5), %s2166_s7, 4294966272  ;;  %s26_s26 = sadd.s32 1, %s3655_s27   ;;  %s3656_s8 = sld [smem:[#allocation20_spill]] }
 0x79d   : > { %p23_p6 = scmp.ge.s32.totalorder %s26_s26, 4   ;;  %s3657_s23 = sld [smem:[#allocation23_spill]] }
 0x79e   : > { %s3658_s11 = sld [smem:[#allocation22_spill]]  ;;  %s3659_s21 = smov %s2815_s22 }
 0x79f   : > { %s3661_s24 = smov %s2827_s25 }
 0x7a0   :  { %25 = sbr.rel (!%p23_p6) target bundleno = 13 (0xd), region = 120 }
 0x7a2   : > { %s3660_s22 = smov %s3656_s8 }
 0x7a4   : > { %s3662_s25 = smov %s3658_s11 }
 0x7a5   :  { %2172 = vsyncpa [#allocation3], 1 }
 0x7a6   :  { %2174 = vsyncpa [#allocation3 + $0x1], 1 }
 0x7a7   :  { %2175 = vsyncpa [#allocation6], 1 }
 0x7a8   :  { %2176 = vsyncpa [#allocation9], 1 }
 0x7a9   :  { %2178 = vsyncpa [#allocation9 + $0x1], 1 }
 0x7aa   :  { %2179 = vsyncpa [#allocation4], 1 }
 0x7ab   :  { %2181 = vsyncpa [#allocation4 + $0x1], 1 }

</bundles_post_ra>
